<compile_context>
chip_gen: v7x
topology: tpu7x:2x2x1
jax: 0.10.0
libtpu: 0.0.40
codegen_flags: <defaults>
</compile_context>

<pallas_src>
import functools

import numpy as np
import jax
import jax.numpy as jnp
from jax import lax
from jax.experimental import pallas as pl
from jax.experimental.pallas import tpu as pltpu


_LANE = 128


def _round_up(x, m):
    return (x + m - 1) // m * m


def _vmem_capacity_bytes():
    try:
        info = pltpu.get_tpu_info()
        cap = getattr(info, "vmem_capacity_bytes", None)
        if cap:
            return int(cap)
    except Exception:
        pass
    return 64 << 20          # conservative default (v7x per-core VMEM)


def _vmem_limit(block_bytes):
    # Double-buffered blocks + headroom, floored at the default scoped limit and
    # capped at 75% of physical VMEM (leaves room for compiler scratch).
    cap = _vmem_capacity_bytes()
    need = 2 * block_bytes + (4 << 20)
    return int(min(max(need, 32 << 20), 0.75 * cap))


# ----------------------- conv3x3 stride-2 + bias + ReLU ----------------------

def _conv3x3_kernel(a_ref, w_ref, b_ref, o_ref):
    # Three fused row-tap matmuls (dh = 0, 1, 2): bf16 operands, f32 acc,
    # bias + ReLU fused, bf16 store (lane-dense Coutp).
    acc = jnp.dot(a_ref[0, 0], w_ref[0], preferred_element_type=jnp.float32)
    acc = acc + jnp.dot(a_ref[0, 1], w_ref[1], preferred_element_type=jnp.float32)
    acc = acc + jnp.dot(a_ref[0, 2], w_ref[2], preferred_element_type=jnp.float32)
    o_ref[0] = jnp.maximum(acc + b_ref[...], 0.0).astype(o_ref.dtype)


def _pick_conv_rows(ho, wo, k, coutp, budget):
    # Largest output-row block R (divisor of Ho) whose single-buffered blocks fit
    # `budget`, with bf16-sublane-aligned (16) flattened row dims.
    def blk_bytes(r):
        m = r * wo
        return 3 * m * k * 2 + m * coutp * 2 + 3 * k * coutp * 2 + coutp * 4

    best = None
    for r in range(1, ho + 1):
        if ho % r:
            continue
        m = r * wo
        if not (r == ho or m % 16 == 0):
            continue
        if blk_bytes(r) <= budget:
            best = r
    if best is None:
        for r in range(1, ho + 1):
            if ho % r == 0 and (r == ho or (r * wo) % 8 == 0):
                best = r
                break
    return best, blk_bytes(best)


def conv3x3_s2_relu(x, w, b, budget):
    """3x3 / stride-2 / pad-1 conv + bias + ReLU.

    x: (B, H, W, Cin_x) NHWC bf16 (Cin_x may carry zero-padded channels)
    w: (Cout, Cin, 3, 3) OIHW f32, b: (Cout,) f32
    Returns ((B, Ho*Wo, Coutp) bf16, (Ho, Wo)); Coutp = Cout rounded up to 128,
    padded output channels are exactly zero.
    """
    B, H, W, Cin_x = x.shape
    Cout, Cin_w = w.shape[0], w.shape[1]
    Ho, Wo = H // 2, W // 2
    Coutp = _round_up(Cout, _LANE)
    K = 3 * Cin_x

    # Zero-pad weights to the (possibly channel-padded) input and to a lane-dense
    # Cout; padded output channels stay exactly zero through bias + ReLU.
    w = jnp.pad(w, ((0, Coutp - Cout), (0, Cin_x - Cin_w), (0, 0), (0, 0)))
    b = jnp.pad(b, (0, Coutp - Cout))
    w_hwio = jnp.transpose(w, (2, 3, 1, 0))               # (3, 3, Cin_x, Coutp)
    w_taps = w_hwio.reshape(3, K, Coutp).astype(jnp.bfloat16)
    b2d = b.reshape(1, Coutp).astype(jnp.float32)

    # Three non-overlapping row-tap operands (dh = 0, 1, 2), each (B, Ho*Wo, K)
    # with the three column taps folded into the lane dim. Non-overlapping blocks
    # -> clean (batch, row-block) BlockSpec pipelining with no halos.
    xp = jnp.pad(x, ((0, 0), (1, 1), (1, 1), (0, 0)))

    def taps(rows):                                        # (B, Ho, W+2, Cin_x)
        cols = [rows[:, :, dw:dw + 2 * Wo:2, :] for dw in range(3)]
        return jnp.concatenate(cols, axis=-1).reshape(B, Ho * Wo, K)

    a = jnp.stack([taps(xp[:, dh:dh + 2 * Ho:2]) for dh in range(3)], axis=1)

    R, blk = _pick_conv_rows(Ho, Wo, K, Coutp, budget)
    Mb = R * Wo

    out = pl.pallas_call(
        _conv3x3_kernel,
        out_shape=jax.ShapeDtypeStruct((B, Ho * Wo, Coutp), jnp.bfloat16),
        grid=(B, Ho // R),
        in_specs=[
            pl.BlockSpec((1, 3, Mb, K), lambda i, t: (i, 0, t, 0)),
            pl.BlockSpec((3, K, Coutp), lambda i, t: (0, 0, 0)),
            pl.BlockSpec((1, Coutp), lambda i, t: (0, 0)),
        ],
        out_specs=pl.BlockSpec((1, Mb, Coutp), lambda i, t: (i, t, 0)),
        compiler_params=pltpu.CompilerParams(
            dimension_semantics=("parallel", "parallel"),
            vmem_limit_bytes=_vmem_limit(blk)),
    )(a, w_taps, b2d)
    return out, (Ho, Wo)


# ------------------------- fused PaDiM embedding ------------------------------

def _embed_kernel(g1_ref, g2_ref, g3_ref, s2_ref, s3_ref,
                  p1_ref, p2_ref, p3_ref, o_ref, *, r, w1, dp):
    # Channel reduction first (g @ P, one-hot select, bf16 operands / f32 acc).
    acc = jnp.dot(g1_ref[0], p1_ref[...], preferred_element_type=jnp.float32)

    # Layer-2: width interleave via a small one-hot matmul at the native row
    # count, then a free row-direction x2 nearest upsample (concat + tile-aligned
    # reshape; z2 values are exact bf16 copies so the re-cast is lossless).
    z2 = jnp.dot(g2_ref[0], p2_ref[...], preferred_element_type=jnp.float32)
    u2 = jnp.dot(s2_ref[...], z2.astype(jnp.bfloat16),
                 preferred_element_type=jnp.float32)        # ((r/2)*w1, dp)
    v2 = u2.reshape(r // 2, w1, dp)
    acc = acc + jnp.concatenate([v2, v2], axis=1).reshape(r * w1, dp)

    # Layer-3: same with x4 row replication.
    z3 = jnp.dot(g3_ref[0], p3_ref[...], preferred_element_type=jnp.float32)
    u3 = jnp.dot(s3_ref[...], z3.astype(jnp.bfloat16),
                 preferred_element_type=jnp.float32)        # ((r/4)*w1, dp)
    v3 = u3.reshape(r // 4, w1, dp)
    acc = acc + jnp.concatenate([v3, v3, v3, v3], axis=1).reshape(r * w1, dp)

    o_ref[0] = acc


def _width_interleave_matrix(rows, w1, scale):
    # One-hot (rows*w1, rows*(w1//scale)) width-only nearest-upsample matrix for
    # `rows` rows at the source layer's resolution (row upsample is done for
    # free in-kernel, so this is scale/(scale) x smaller than the full S).
    ws = w1 // scale
    n_out = rows * w1
    idx = np.arange(n_out)
    a, c = idx // w1, idx % w1
    src = a * ws + c // scale
    s = np.zeros((n_out, rows * ws), np.float32)
    s[idx, src] = 1.0
    return jnp.asarray(s, dtype=jnp.bfloat16)


def _pick_embed_rows(h1, w1, c1p, c2p, c3p, dp, budget):
    # Largest layer-1 row block R (multiple of 4, divisor of H1) whose blocks fit
    # `budget`, with bf16-sublane-aligned (16) flattened row dims.
    hw1 = h1 * w1
    hw2 = (h1 // 2) * (w1 // 2)
    hw3 = (h1 // 4) * (w1 // 4)

    def ok(tm, full, mult):
        return tm == full or tm % mult == 0

    def blk_bytes(r):
        tm1 = r * w1
        tm2 = (r // 2) * (w1 // 2)
        tm3 = (r // 4) * (w1 // 4)
        return ((tm1 * c1p + tm2 * c2p + tm3 * c3p) * 2        # bf16 g blocks
                + tm1 * dp * 4                                 # f32 output block
                + ((tm1 // 2) * tm2 + (tm1 // 4) * tm3) * 2    # bf16 interleave
                + (c1p + c2p + c3p) * dp * 2)                  # bf16 P matrices

    best = None
    for r in range(4, h1 + 1, 4):
        if h1 % r:
            continue
        tm1, tm2, tm3 = r * w1, (r // 2) * (w1 // 2), (r // 4) * (w1 // 4)
        if not (ok(tm1, hw1, 16) and ok(tm2, hw2, 16) and ok(tm3, hw3, 16)):
            continue
        if blk_bytes(r) <= budget:
            best = r
    if best is None:
        for r in range(4, h1 + 1, 4):
            if h1 % r:
                continue
            tm1, tm2, tm3 = r * w1, (r // 2) * (w1 // 2), (r // 4) * (w1 // 4)
            if ok(tm1, hw1, 8) and ok(tm2, hw2, 8) and ok(tm3, hw3, 8):
                best = r
                break
    if best is None:
        best = h1
    return best, blk_bytes(best)


def fused_embedding(g1, g2, g3, h1w1, p1, p2, p3, budget):
    B, HW1, C1p = g1.shape
    _, HW2, C2p = g2.shape
    _, HW3, C3p = g3.shape
    H1, W1 = h1w1
    dp = p1.shape[1]

    R, blk = _pick_embed_rows(H1, W1, C1p, C2p, C3p, dp, budget)
    TM1 = R * W1
    TM2 = (R // 2) * (W1 // 2)
    TM3 = (R // 4) * (W1 // 4)
    s2w = _width_interleave_matrix(R // 2, W1, 2)
    s3w = _width_interleave_matrix(R // 4, W1, 4)

    kernel = functools.partial(_embed_kernel, r=R, w1=W1, dp=dp)
    return pl.pallas_call(
        kernel,
        out_shape=jax.ShapeDtypeStruct((B, HW1, dp), jnp.float32),
        grid=(B, H1 // R),
        in_specs=[
            pl.BlockSpec((1, TM1, C1p), lambda i, t: (i, t, 0)),
            pl.BlockSpec((1, TM2, C2p), lambda i, t: (i, t, 0)),
            pl.BlockSpec((1, TM3, C3p), lambda i, t: (i, t, 0)),
            # Constant index_map -> fetched once and re-used across grid steps.
            pl.BlockSpec((TM1 // 2, TM2), lambda i, t: (0, 0)),
            pl.BlockSpec((TM1 // 4, TM3), lambda i, t: (0, 0)),
            pl.BlockSpec((C1p, dp), lambda i, t: (0, 0)),
            pl.BlockSpec((C2p, dp), lambda i, t: (0, 0)),
            pl.BlockSpec((C3p, dp), lambda i, t: (0, 0)),
        ],
        out_specs=pl.BlockSpec((1, TM1, dp), lambda i, t: (i, t, 0)),
        compiler_params=pltpu.CompilerParams(
            dimension_semantics=("parallel", "parallel"),
            vmem_limit_bytes=_vmem_limit(blk)),
    )(g1, g2, g3, s2w, s3w, p1, p2, p3)


# ------------------------------- JAX glue ------------------------------------

def channel_select_matrices(select_index, channel_splits, padded_splits, d_pad):
    # Per-layer one-hot (C_l_padded, d_pad) scatter matrices (bf16, exact):
    # column k is the one-hot row of select_index[k] if it falls in layer l.
    sel = np.asarray(select_index)
    mats, off = [], 0
    for c, cp in zip(channel_splits, padded_splits):
        P = np.zeros((cp, d_pad), np.float32)
        ks = np.nonzero((sel >= off) & (sel < off + c))[0]
        P[sel[ks] - off, ks] = 1.0
        mats.append(jnp.asarray(P, dtype=jnp.bfloat16))
        off += c
    return mats


def padim_export_forward(x_nchw, params, select_index):
    budget = _vmem_capacity_bytes() // 4   # single-buffered block budget
    # Single layout change at the model boundary; backbone + embedding stay in
    # NHWC / (B, HW, C) bf16 throughout (no per-layer transposes or casts).
    x = jnp.transpose(x_nchw, (0, 2, 3, 1)).astype(jnp.bfloat16)
    B = x.shape[0]

    f1, (H1, W1) = conv3x3_s2_relu(x, params['w1'], params['b1'], budget)
    f2, (H2, W2) = conv3x3_s2_relu(f1.reshape(B, H1, W1, -1),
                                   params['w2'], params['b2'], budget)
    f3, _ = conv3x3_s2_relu(f2.reshape(B, H2, W2, -1),
                            params['w3'], params['b3'], budget)

    C1 = params['w1'].shape[0]
    C2 = params['w2'].shape[0]
    C3 = params['w3'].shape[0]
    C1p, C2p, C3p = f1.shape[-1], f2.shape[-1], f3.shape[-1]
    d = int(select_index.shape[0])
    dp = _round_up(d, _LANE)                      # lane-dense embedding output
    p1, p2, p3 = channel_select_matrices(select_index, (C1, C2, C3),
                                         (C1p, C2p, C3p), dp)
    out = fused_embedding(f1, f2, f3, (H1, W1), p1, p2, p3, budget)
    return out[:, :, :d]                          # drop lane padding


# ------------------------------ Pure-JAX ref ----------------------------------

def reference_forward(x, params, select_index):
    def conv_relu(inp, w, b):
        y = lax.conv_general_dilated(
            inp, w, window_strides=(2, 2), padding=((1, 1), (1, 1)),
            dimension_numbers=('NCHW', 'OIHW', 'NCHW'))
        return jnp.maximum(y + b.reshape(1, -1, 1, 1), 0.0)

    f1 = conv_relu(x, params['w1'], params['b1'])
    f2 = conv_relu(f1, params['w2'], params['b2'])
    f3 = conv_relu(f2, params['w3'], params['b3'])
    f2u = jnp.repeat(jnp.repeat(f2, 2, axis=2), 2, axis=3)    # nearest x2
    f3u = jnp.repeat(jnp.repeat(f3, 4, axis=2), 4, axis=3)    # nearest x4
    emb = jnp.concatenate([f1, f2u, f3u], axis=1)
    emb = emb[:, select_index, :, :]                          # index_select dim=1
    Bn, C, H, W = emb.shape
    return emb.reshape(Bn, C, H * W).transpose(0, 2, 1)       # transpose(2, 1)


# --------------------------------- main ---------------------------------------

if __name__ == "__main__":
    key = jax.random.PRNGKey(0)
    # Small toy configuration (real PaDiM uses a pretrained backbone at 224x224).
    B, Cin, H, W = 2, 4, 64, 64
    C1, C2, C3 = 16, 32, 64
    d_reduced = 64

    k_x, k_w1, k_b1, k_w2, k_b2, k_w3, k_b3, k_sel = jax.random.split(key, 8)
    x = jax.random.normal(k_x, (B, Cin, H, W), dtype=jnp.float32)
    params = {
        'w1': 0.1 * jax.random.normal(k_w1, (C1, Cin, 3, 3), jnp.float32),
        'b1': 0.1 * jax.random.normal(k_b1, (C1,), jnp.float32),
        'w2': 0.1 * jax.random.normal(k_w2, (C2, C1, 3, 3), jnp.float32),
        'b2': 0.1 * jax.random.normal(k_b2, (C2,), jnp.float32),
        'w3': 0.1 * jax.random.normal(k_w3, (C3, C2, 3, 3), jnp.float32),
        'b3': 0.1 * jax.random.normal(k_b3, (C3,), jnp.float32),
    }
    C_total = C1 + C2 + C3
    select_index = jax.random.permutation(k_sel, C_total)[:d_reduced]

    out = padim_export_forward(x, params, select_index)
    out = jax.block_until_ready(out)

    ref = reference_forward(x, params, select_index)
    assert out.shape == (B, (H // 2) * (W // 2), d_reduced), out.shape
    # bf16 backbone + bf16 one-hot selection vs. pure-f32 reference: ~bf16-level
    # tolerance (one-hot select/upsample paths are exact; conv chain is bf16).
    np.testing.assert_allclose(np.asarray(out), np.asarray(ref),
                               rtol=2e-2, atol=2e-2)
    print("KERNEL_OK")
</pallas_src>

<mosaic_0001>
module attributes {stable_mosaic.version = 11 : i64} {
  func.func @_conv3x3_kernel(%arg0: i32, %arg1: i32, %arg2: memref<1x3x1024x12xbf16, #tpu.memory_space<vmem>>, %arg3: memref<3x12x128xbf16, #tpu.memory_space<vmem>>, %arg4: memref<1x128xf32, #tpu.memory_space<vmem>>, %arg5: memref<1x1024x128xbf16, #tpu.memory_space<vmem>>) attributes {dimension_semantics = [#tpu.dimension_semantics<parallel>, #tpu.dimension_semantics<parallel>], iteration_bounds = array<i64: 2, 1>, scalar_prefetch = 0 : i64, scratch_operands = 0 : i64, tpu.core_type = #tpu.core_type<tc>, window_params = [{transform_indices = @transform_0, window_bounds = array<i64: 1, 3, 1024, 12>}, {pipeline_mode = #tpu.pipeline_mode<synchronous>, transform_indices = @transform_1, window_bounds = array<i64: 3, 12, 128>}, {pipeline_mode = #tpu.pipeline_mode<synchronous>, transform_indices = @transform_2, window_bounds = array<i64: 1, 128>}, {transform_indices = @transform_3, window_bounds = array<i64: 1, 1024, 128>}]} {
    %c0 = arith.constant 0 : index
    %c0_0 = arith.constant 0 : index
    %c0_1 = arith.constant 0 : index
    %c0_2 = arith.constant 0 : index
    %0 = vector.load %arg2[%c0, %c0_0, %c0_1, %c0_2] : memref<1x3x1024x12xbf16, #tpu.memory_space<vmem>>, vector<1x1x1024x12xbf16>
    %1 = vector.shape_cast %0 : vector<1x1x1024x12xbf16> to vector<1024x12xbf16>
    %c0_3 = arith.constant 0 : index
    %c0_4 = arith.constant 0 : index
    %c0_5 = arith.constant 0 : index
    %2 = vector.load %arg3[%c0_3, %c0_4, %c0_5] : memref<3x12x128xbf16, #tpu.memory_space<vmem>>, vector<1x12x128xbf16>
    %3 = vector.shape_cast %2 : vector<1x12x128xbf16> to vector<12x128xbf16>
    %cst = arith.constant dense<0.000000e+00> : vector<1024x128xf32>
    %4 = tpu.matmul %1, %3, %cst {dimension_numbers = #tpu.dot_dimension_numbers<[1], [0], [0], [1], [0, 0, 1, 1], [], []>} : vector<1024x12xbf16>, vector<12x128xbf16>, vector<1024x128xf32> -> vector<1024x128xf32>
    %c0_6 = arith.constant 0 : index
    %c1 = arith.constant 1 : index
    %c0_7 = arith.constant 0 : index
    %c0_8 = arith.constant 0 : index
    %5 = vector.load %arg2[%c0_6, %c1, %c0_7, %c0_8] : memref<1x3x1024x12xbf16, #tpu.memory_space<vmem>>, vector<1x1x1024x12xbf16>
    %6 = vector.shape_cast %5 : vector<1x1x1024x12xbf16> to vector<1024x12xbf16>
    %c1_9 = arith.constant 1 : index
    %c0_10 = arith.constant 0 : index
    %c0_11 = arith.constant 0 : index
    %7 = vector.load %arg3[%c1_9, %c0_10, %c0_11] : memref<3x12x128xbf16, #tpu.memory_space<vmem>>, vector<1x12x128xbf16>
    %8 = vector.shape_cast %7 : vector<1x12x128xbf16> to vector<12x128xbf16>
    %cst_12 = arith.constant dense<0.000000e+00> : vector<1024x128xf32>
    %9 = tpu.matmul %6, %8, %cst_12 {dimension_numbers = #tpu.dot_dimension_numbers<[1], [0], [0], [1], [0, 0, 1, 1], [], []>} : vector<1024x12xbf16>, vector<12x128xbf16>, vector<1024x128xf32> -> vector<1024x128xf32>
    %10 = arith.addf %4, %9 : vector<1024x128xf32>
    %c0_13 = arith.constant 0 : index
    %c2 = arith.constant 2 : index
    %c0_14 = arith.constant 0 : index
    %c0_15 = arith.constant 0 : index
    %11 = vector.load %arg2[%c0_13, %c2, %c0_14, %c0_15] : memref<1x3x1024x12xbf16, #tpu.memory_space<vmem>>, vector<1x1x1024x12xbf16>
    %12 = vector.shape_cast %11 : vector<1x1x1024x12xbf16> to vector<1024x12xbf16>
    %c2_16 = arith.constant 2 : index
    %c0_17 = arith.constant 0 : index
    %c0_18 = arith.constant 0 : index
    %13 = vector.load %arg3[%c2_16, %c0_17, %c0_18] : memref<3x12x128xbf16, #tpu.memory_space<vmem>>, vector<1x12x128xbf16>
    %14 = vector.shape_cast %13 : vector<1x12x128xbf16> to vector<12x128xbf16>
    %cst_19 = arith.constant dense<0.000000e+00> : vector<1024x128xf32>
    %15 = tpu.matmul %12, %14, %cst_19 {dimension_numbers = #tpu.dot_dimension_numbers<[1], [0], [0], [1], [0, 0, 1, 1], [], []>} : vector<1024x12xbf16>, vector<12x128xbf16>, vector<1024x128xf32> -> vector<1024x128xf32>
    %16 = arith.addf %10, %15 : vector<1024x128xf32>
    %c0_20 = arith.constant 0 : index
    %c0_21 = arith.constant 0 : index
    %17 = vector.load %arg4[%c0_20, %c0_21] : memref<1x128xf32, #tpu.memory_space<vmem>>, vector<1x128xf32>
    %18 = vector.broadcast %17 : vector<1x128xf32> to vector<1024x128xf32>
    %19 = arith.addf %16, %18 : vector<1024x128xf32>
    %cst_22 = arith.constant 0.000000e+00 : f32
    %20 = vector.broadcast %cst_22 : f32 to vector<1024x128xf32>
    %21 = arith.maximumf %19, %20 : vector<1024x128xf32>
    %22 = arith.truncf %21 : vector<1024x128xf32> to vector<1024x128xbf16>
    %c0_23 = arith.constant 0 : index
    %c0_24 = arith.constant 0 : index
    %c0_25 = arith.constant 0 : index
    %23 = vector.load %arg5[%c0_23, %c0_24, %c0_25] : memref<1x1024x128xbf16, #tpu.memory_space<vmem>>, vector<1x1024x128xbf16>
    %24 = vector.shape_cast %23 : vector<1x1024x128xbf16> to vector<1024x128xbf16>
    %25 = vector.shape_cast %22 : vector<1024x128xbf16> to vector<1x1024x128xbf16>
    tpu.vector_store %arg5[%c0_23, %c0_24, %c0_25], %25 {strides = array<i32>} : memref<1x1024x128xbf16, #tpu.memory_space<vmem>>, vector<1x1024x128xbf16>,
    return
  }
  func.func @transform_0(%arg0: i32, %arg1: i32) -> (i32, i32, i32, i32) {
    %c0_i32 = arith.constant 0 : i32
    %c0_i32_0 = arith.constant 0 : i32
    %c0_i32_1 = arith.constant 0 : i32
    return %arg0, %c0_i32, %arg1, %c0_i32_0 : i32, i32, i32, i32
  }
  func.func @transform_1(%arg0: i32, %arg1: i32) -> (i32, i32, i32) {
    %c0_i32 = arith.constant 0 : i32
    %c0_i32_0 = arith.constant 0 : i32
    %c0_i32_1 = arith.constant 0 : i32
    %c0_i32_2 = arith.constant 0 : i32
    return %c0_i32, %c0_i32_0, %c0_i32_1 : i32, i32, i32
  }
  func.func @transform_2(%arg0: i32, %arg1: i32) -> (i32, i32) {
    %c0_i32 = arith.constant 0 : i32
    %c0_i32_0 = arith.constant 0 : i32
    %c0_i32_1 = arith.constant 0 : i32
    return %c0_i32, %c0_i32_0 : i32, i32
  }
  func.func @transform_3(%arg0: i32, %arg1: i32) -> (i32, i32, i32) {
    %c0_i32 = arith.constant 0 : i32
    %c0_i32_0 = arith.constant 0 : i32
    return %arg0, %arg1, %c0_i32 : i32, i32, i32
  }
}

</mosaic_0001>

<bundles_post_ra>
// kernel: tpu_custom_call.1
= control target key start
LH: loop header
LB: loop body
LE: loop exit
PB: predicated region body
PF: predicated region fallthrough
CT: control target
= control target key end

     0   :  { %8 = vsyncpa [#allocation3], 0  ;;  %s8340_s0 = inlined_call_operand.vmem [shape: bf16[2,3,1024,12], index: 0, kind: input, shape index: {}]   ;;  %s8341_s1 = inlined_call_operand.vmem [shape: bf16[3,12,128], index: 1, kind: input, shape index: {}]   ;;  %s8342_s2 = inlined_call_operand.vmem [shape: f32[1,128], index: 2, kind: input, shape index: {}]   ;;  %s8343_s3 = inlined_call_operand.hbm [shape: bf16[2,1024,128], index: 3, kind: output, shape index: {}]  }
   0x1   :  { %10 = vsyncpa [#allocation3 + $0x1], 0  ;;  %s7422_s12 = smov 0   ;;  %s7424_s13 = smov 0  }
   0x2   :  { %s7426_s14 = smov 0   ;;  %s7428_s15 = smov 0  }
   0x3   :  { %s7430_s16 = smov 0   ;;  %s7432_s17 = smov 0  }
   0x4 LB: > { %s4918_s18 = sadd.s32 4294967295, %s7397_s17   ;;  %s4919_s19 = sadd.s32 4294967294, %s7397_s17   ;;  %s7397_s17 = sphi %s7432_s17, %s16_s17   ;;  %s7393_s16 = sphi %s7430_s16, %s8384_s16   ;;  %s7389_s15 = sphi %s7428_s15, %s8383_s15   ;;  %s7385_s14 = sphi %s7426_s14, %s8382_s14   ;;  %s7381_s13 = sphi %s7424_s13, %s8381_s13   ;;  %s7377_s12 = sphi %s7422_s12, %s8380_s12  }
   0x5   : > { %s28_s20 = sadd.s32 1, %s7393_s16  ;;  %s107_s21 = sadd.s32 1, %s7385_s14 }
   0x6   : > { %p30_p0 = scmp.ge.s32.totalorder %s28_s20, 2  ;;  %p117_p1 = scmp.ne.s32.totalorder %s7385_s14, %s7381_s13 }
   0x7   : > { %p118_p2 = scmp.eq.s32.totalorder %s4918_s18, 1  ;;  %p123_p3 = scmp.ne.s32.totalorder %s7381_s13, %s7377_s12 }
   0x8   : > { %s8386_s20 = smov (%p30_p0, %s28_s20), 0  ;;  %p124_p5 = scmp.eq.s32.totalorder %s4919_s19, 1 }
   0x9   : > { %p7462_p4 = por %p118_p2, %p117_p1  ;;  %s102_s23 = ssub.s32 %s7393_s16, %s8386_s20 }
   0xa   : > { %p4922_p6 = scmp.ge.s32.totalorder %s7397_s17, 1  ;;  %p105_p7 = scmp.eq.s32.totalorder %s102_s23, 0 }
   0xb   : > { %p7469_p8 = por %p124_p5, %p123_p3  ;;  %p161_p9 = scmp.lt.s32.totalorder %s7397_s17, 3 }
   0xc   : > { %s7475_s25 = scalar_select %p105_p7, %s7385_s14, %s107_s21  }
   0xd   : > { %p162_p10 = pnand %p4922_p6, %p161_p9 }
   0xf   : > { %165 = sbr.rel (%p162_p10) target bundleno = 646 (0x286), region = 32 }
  0x16   : > { %v7123_v0 = vld [vmem:[%s8341_s1 + $0x8] sm:$0x3f]   ;;  %vm981_vm0 = vcmask 1045504   ;;  %p190_p11 = scmp.lt.s32.totalorder %s7389_s15, 1  ;;  %v7124_v1 = vld [vmem:[%s8341_s1] sm:$0x3f]  }
  0x17   : > { %7061 = vmatprep.subr.msk.bf16.mxu1 %vm981_vm0, %v7123_v0  ;;  %v983_v2 = vsel %vm981_vm0, %v7123_v0, 0  ;;  %v7127_v3 = vld [vmem:[%s8341_s1 + $0x10] sm:$0x3f]   ;;  %7062 = vmatprep.subr.msk.bf16.mxu0 %vm981_vm0, %v7124_v1  ;;  %v2048_v4 = vsel %vm981_vm0, %v7124_v1, 0  ;;  %vm788_vm1 = vcmask 97280   ;;  %s186_s18 = sand.u32 1, %s7381_s13  }
  0x18   : > { %6414 = vmatpush3.bf16.msra.mxu1 %v983_v2  ;;  %s191_s30 = scalar_select %p190_p11, %s7389_s15, 1  ;;  %6544 = vmatpush3.bf16.msra.mxu0 %v2048_v4  ;;  %v3245_v9 = vsel %vm981_vm0, %v7127_v3, 0 }
  0x19   : > { %7063 = vmatprep.subr.msk.bf16.mxu1 %vm981_vm0, %v7124_v1  ;;  %7064 = vmatprep.subr.msk.bf16.mxu0 %vm981_vm0, %v7127_v3  ;;  %s4923_s19 = sshll.u32 %s186_s18, 9  ;;  %s5834_s27 = sshll.u32 %s7389_s15, 13 }
  0x1a   : > { %s7065_s6 = smul.u32 1536, %s191_s30  ;;  %s8006_s21 = scalar_lea.vmem [#allocation2], %s4923_s19 }
  0x1b   : > { %s4839_s28 = sshll.u32 %s8006_s21, 4  ;;  %s8286_s4 = scalar_lea.hbm %s8343_s3, %s5834_s27  ;;  %s8288_s28 = int_to_ptr.vmem [resolvable:$true] %s4839_s28 }
  0x1c   : > { %s7497_s9 = scalar_lea.vmem %s8340_s0, %s7065_s6  ;;  %s8294_s15 = scalar_lea.sflag [#allocation3], %s186_s18 }
  0x1d   : > { %v7125_v5 = vld [vmem:[%s7497_s9 + $0x200] sm:$0xff]   ;;  %v7128_v7 = vld [vmem:[%s7497_s9 + $0x208] sm:$0xff]   ;;  %v7130_v10 = vld [vmem:[%s7497_s9 + $0x210] sm:$0xff]   ;;  %s7319_s5 = scalar_lea.vmem %s8288_s28, 8192  ;;  %s7399_s6 = smov [#allocation2]  }
  0x1e   : > { %v7126_v6 = vld [vmem:[%s7497_s9] sm:$0xff]   ;;  %6415 = vmatprep.mubr.msk.bf16.mxu1 %vm788_vm1, %v7125_v5  ;;  %v7129_v8 = vld [vmem:[%s7497_s9 + $0x8] sm:$0xff]   ;;  %v7131_v11 = vld [vmem:[%s7497_s9 + $0x10] sm:$0xff]   ;;  %p7320_p12 = scmp.ne.s32.totalorder %s8288_s28, %s7319_s5  ;;  %s7323_s7 = sshll.u32 %s7399_s6, 4  ;;  %s7324_s7 = int_to_ptr.vmem [resolvable:$false] %s7323_s7 }
  0x1f   : > { %6545 = vmatprep.mubr.msk.bf16.mxu0 %vm788_vm1, %v7126_v6  ;;  %6416 = vmatmul.mubr.msk.bf16.vlgmr.msra.gmra.mrb[0].mxu1 %vm788_vm1, %v7128_v7  ;;  %v7132_v12 = vld [vmem:[%s7497_s9 + $0x218] sm:$0xff]   ;;  %v7134_v14 = vld [vmem:[%s7497_s9 + $0x220] sm:$0xff]   ;;  %v7136_v16 = vld [vmem:[%s7497_s9 + $0x228] sm:$0xff]   ;;  %s7325_s8 = scalar_lea.vmem %s7324_s7, 16384  ;;  %p7326_p1 = scmp.lt.s32.totalorder %s8288_s28, %s7324_s7 }
  0x20   : > { %6804 = vmatpush3.bf16.msra.mxu1 %v2048_v4  ;;  %6546 = vmatmul.mubr.msk.bf16.vlgmr.msra.gmra.mrb[0].mxu0 %vm788_vm1, %v7129_v8  ;;  %v7133_v13 = vld [vmem:[%s7497_s9 + $0x18] sm:$0xff]   ;;  %v7135_v15 = vld [vmem:[%s7497_s9 + $0x20] sm:$0xff]   ;;  %v7137_v17 = vld [vmem:[%s7497_s9 + $0x28] sm:$0xff]   ;;  %p7321_p13 = pnand %p7320_p12, %p7462_p4  ;;  %p7327_p2 = scmp.lt.s32.totalorder %s7325_s8, %s7319_s5 }
  0x21   : > { %6674 = vmatpush3.bf16.msra.mxu0 %v3245_v9  ;;  %6419 = vmatprep.mubr.msk.bf16.mxu1 %vm788_vm1, %v7130_v10  ;;  %v7138_v18 = vld [vmem:[%s7497_s9 + $0x230] sm:$0xff]   ;;  %v7140_v20 = vld [vmem:[%s7497_s9 + $0x238] sm:$0xff]   ;;  %v7142_v22 = vld [vmem:[%s7497_s9 + $0x240] sm:$0xff]  }
  0x22   : > { %6549 = vmatprep.mubr.msk.bf16.mxu0 %vm788_vm1, %v7131_v11  ;;  %v7139_v19 = vld [vmem:[%s7497_s9 + $0x30] sm:$0xff]   ;;  %v7141_v21 = vld [vmem:[%s7497_s9 + $0x38] sm:$0xff]   ;;  %v7143_v23 = vld [vmem:[%s7497_s9 + $0x40] sm:$0xff]   ;;  %p7322_p0 = pneg %p7321_p13  ;;  %p7328_p3 = por %p7327_p2, %p7326_p1 }
  0x23   : > { %v7144_v24 = vld [vmem:[%s7497_s9 + $0x248] sm:$0xff]   ;;  %v7146_v26 = vld [vmem:[%s7497_s9 + $0x250] sm:$0xff]   ;;  %v7148_v28 = vld [vmem:[%s7497_s9 + $0x258] sm:$0xff]  }
  0x24   : > { %v7145_v25 = vld [vmem:[%s7497_s9 + $0x48] sm:$0xff]   ;;  %v7147_v27 = vld [vmem:[%s7497_s9 + $0x50] sm:$0xff]   ;;  %v7149_v29 = vld [vmem:[%s7497_s9 + $0x58] sm:$0xff]   ;;  %p7329_p5 = pnand %p7328_p3, %p7322_p0 }
  0x25   : > { %v7150_v30 = vld [vmem:[%s7497_s9 + $0x260] sm:$0xff]   ;;  %v7152_v32 = vld [vmem:[%s7497_s9 + $0x268] sm:$0xff]   ;;  %v7154_v34 = vld [vmem:[%s7497_s9 + $0x270] sm:$0xff]  }
  0x26   : > { %v7151_v31 = vld [vmem:[%s7497_s9 + $0x60] sm:$0xff]   ;;  %v7153_v33 = vld [vmem:[%s7497_s9 + $0x68] sm:$0xff]   ;;  %v7155_v35 = vld [vmem:[%s7497_s9 + $0x70] sm:$0xff]  }
  0x27   : > { %6420 = vmatmul.mubr.msk.bf16.gmra.mrb[4].mxu1 %vm788_vm1, %v7132_v12  ;;  %v7156_v36 = vld [vmem:[%s7497_s9 + $0x278] sm:$0xff]   ;;  %v7158_v38 = vld [vmem:[%s7497_s9 + $0x280] sm:$0xff]   ;;  %v7160_v40 = vld [vmem:[%s7497_s9 + $0x288] sm:$0xff]  }
  0x28   : > { %6550 = vmatmul.mubr.msk.bf16.gmra.mrb[4].mxu0 %vm788_vm1, %v7133_v13  ;;  %6423 = vmatprep.mubr.msk.bf16.mxu1 %vm788_vm1, %v7134_v14  ;;  %v7157_v37 = vld [vmem:[%s7497_s9 + $0x78] sm:$0xff]   ;;  %v7159_v39 = vld [vmem:[%s7497_s9 + $0x80] sm:$0xff]   ;;  %v7161_v41 = vld [vmem:[%s7497_s9 + $0x88] sm:$0xff]  }
  0x29   : > { %6553 = vmatprep.mubr.msk.bf16.mxu0 %vm788_vm1, %v7135_v15  ;;  %v7162_v42 = vld [vmem:[%s7497_s9 + $0x290] sm:$0xff]   ;;  %v7164_v44 = vld [vmem:[%s7497_s9 + $0x298] sm:$0xff]   ;;  %v7166_v46 = vld [vmem:[%s7497_s9 + $0x2a0] sm:$0xff]  }
  0x2a   : > { %v7163_v43 = vld [vmem:[%s7497_s9 + $0x90] sm:$0xff]   ;;  %v7165_v45 = vld [vmem:[%s7497_s9 + $0x98] sm:$0xff]   ;;  %v7167_v47 = vld [vmem:[%s7497_s9 + $0xa0] sm:$0xff]  }
  0x2b   : > { %v7168_v48 = vld [vmem:[%s7497_s9 + $0x2a8] sm:$0xff]   ;;  %v7170_v50 = vld [vmem:[%s7497_s9 + $0x2b0] sm:$0xff]   ;;  %v7172_v52 = vld [vmem:[%s7497_s9 + $0x2b8] sm:$0xff]  }
  0x2c   : > { %v7169_v49 = vld [vmem:[%s7497_s9 + $0xa8] sm:$0xff]   ;;  %v7171_v51 = vld [vmem:[%s7497_s9 + $0xb0] sm:$0xff]   ;;  %v7173_v53 = vld [vmem:[%s7497_s9 + $0xb8] sm:$0xff]  }
  0x2d   : > { %v7174_v54 = vld [vmem:[%s7497_s9 + $0x2c0] sm:$0xff]   ;;  %v7176_v56 = vld [vmem:[%s7497_s9 + $0x2c8] sm:$0xff]   ;;  %v7178_v58 = vld [vmem:[%s7497_s9 + $0x2d0] sm:$0xff]  }
  0x2e   : > { %v7175_v55 = vld [vmem:[%s7497_s9 + $0xc0] sm:$0xff]   ;;  %v7177_v57 = vld [vmem:[%s7497_s9 + $0xc8] sm:$0xff]   ;;  %v7179_v59 = vld [vmem:[%s7497_s9 + $0xd0] sm:$0xff]  }
  0x2f   : > { %6424 = vmatmul.mubr.msk.bf16.gmra.mrb[8].mxu1 %vm788_vm1, %v7136_v16  ;;  %v7180_v60 = vld [vmem:[%s7497_s9 + $0x2d8] sm:$0xff]   ;;  %v7182_v62 = vld [vmem:[%s7497_s9 + $0x2e0] sm:$0xff]   ;;  %v7184_v0 = vld [vmem:[%s7497_s9 + $0x2e8] sm:$0xff]  }
  0x30   : > { %6554 = vmatmul.mubr.msk.bf16.gmra.mrb[8].mxu0 %vm788_vm1, %v7137_v17  ;;  %6427 = vmatprep.mubr.msk.bf16.mxu1 %vm788_vm1, %v7138_v18  ;;  %v7181_v61 = vld [vmem:[%s7497_s9 + $0xd8] sm:$0xff]   ;;  %v7183_v63 = vld [vmem:[%s7497_s9 + $0xe0] sm:$0xff]   ;;  %v7185_v1 = vld [vmem:[%s7497_s9 + $0xe8] sm:$0xff]  }
  0x31   : > { %6557 = vmatprep.mubr.msk.bf16.mxu0 %vm788_vm1, %v7139_v19  ;;  %v7186_v2 = vld [vmem:[%s7497_s9 + $0x2f0] sm:$0xff]   ;;  %v7188_v4 = vld [vmem:[%s7497_s9 + $0x2f8] sm:$0xff]   ;;  %v7190_v6 = vld [vmem:[%s7497_s9 + $0x300] sm:$0xff]  }
  0x32   : > { %v7187_v3 = vld [vmem:[%s7497_s9 + $0xf0] sm:$0xff]   ;;  %v7189_v5 = vld [vmem:[%s7497_s9 + $0xf8] sm:$0xff]   ;;  %v7191_v7 = vld [vmem:[%s7497_s9 + $0x400] sm:$0xff]  }
  0x33   : > { %v7192_v8 = vld [vmem:[%s7497_s9 + $0x308] sm:$0xff]   ;;  %v7194_v10 = vld [vmem:[%s7497_s9 + $0x310] sm:$0xff]   ;;  %v7196_v12 = vld [vmem:[%s7497_s9 + $0x318] sm:$0xff]  }
  0x34   : > { %v7193_v9 = vld [vmem:[%s7497_s9 + $0x408] sm:$0xff]   ;;  %v7195_v11 = vld [vmem:[%s7497_s9 + $0x410] sm:$0xff]   ;;  %v7197_v13 = vld [vmem:[%s7497_s9 + $0x418] sm:$0xff]  }
  0x35   : > { %v7198_v14 = vld [vmem:[%s7497_s9 + $0x320] sm:$0xff]   ;;  %v7200_v16 = vld [vmem:[%s7497_s9 + $0x328] sm:$0xff]   ;;  %v7202_v18 = vld [vmem:[%s7497_s9 + $0x330] sm:$0xff]  }
  0x36   : > { %v7199_v15 = vld [vmem:[%s7497_s9 + $0x420] sm:$0xff]   ;;  %v7201_v17 = vld [vmem:[%s7497_s9 + $0x428] sm:$0xff]   ;;  %v7203_v19 = vld [vmem:[%s7497_s9 + $0x430] sm:$0xff]  }
  0x37   : > { %6428 = vmatmul.mubr.msk.bf16.gmra.mrb[12].mxu1 %vm788_vm1, %v7140_v20  ;;  %v7204_v20 = vld [vmem:[%s7497_s9 + $0x338] sm:$0xff]  }
  0x38   : > { %6558 = vmatmul.mubr.msk.bf16.gmra.mrb[12].mxu0 %vm788_vm1, %v7141_v21  ;;  %6431 = vmatprep.mubr.msk.bf16.mxu1 %vm788_vm1, %v7142_v22  ;;  %v7205_v21 = vld [vmem:[%s7497_s9 + $0x438] sm:$0xff]   ;;  %v7206_v22 = vld [vmem:[%s7497_s9 + $0x340] sm:$0xff]  }
  0x39   : > { %6561 = vmatprep.mubr.msk.bf16.mxu0 %vm788_vm1, %v7143_v23  ;;  %v7207_v23 = vld [vmem:[%s7497_s9 + $0x440] sm:$0xff]  }
  0x3f   : > { %6432 = vmatmul.mubr.msk.bf16.gmra.mrb[16].mxu1 %vm788_vm1, %v7144_v24  ;;  %v7208_v24 = vld [vmem:[%s7497_s9 + $0x348] sm:$0xff]  }
  0x40   : > { %6562 = vmatmul.mubr.msk.bf16.gmra.mrb[16].mxu0 %vm788_vm1, %v7145_v25  ;;  %6435 = vmatprep.mubr.msk.bf16.mxu1 %vm788_vm1, %v7146_v26  ;;  %v7209_v25 = vld [vmem:[%s7497_s9 + $0x448] sm:$0xff]   ;;  %v7210_v26 = vld [vmem:[%s7497_s9 + $0x350] sm:$0xff]  }
  0x41   : > { %6565 = vmatprep.mubr.msk.bf16.mxu0 %vm788_vm1, %v7147_v27  ;;  %v7211_v27 = vld [vmem:[%s7497_s9 + $0x450] sm:$0xff]  }
  0x47   : > { %6436 = vmatmul.mubr.msk.bf16.gmra.mrb[20].mxu1 %vm788_vm1, %v7148_v28  ;;  %v7212_v28 = vld [vmem:[%s7497_s9 + $0x358] sm:$0xff]  }
  0x48   : > { %6566 = vmatmul.mubr.msk.bf16.gmra.mrb[20].mxu0 %vm788_vm1, %v7149_v29  ;;  %6439 = vmatprep.mubr.msk.bf16.mxu1 %vm788_vm1, %v7150_v30  ;;  %v7213_v29 = vld [vmem:[%s7497_s9 + $0x458] sm:$0xff]   ;;  %v7214_v30 = vld [vmem:[%s7497_s9 + $0x360] sm:$0xff]  }
  0x49   : > { %6569 = vmatprep.mubr.msk.bf16.mxu0 %vm788_vm1, %v7151_v31  ;;  %v7215_v31 = vld [vmem:[%s7497_s9 + $0x460] sm:$0xff]  }
  0x4f   : > { %6440 = vmatmul.mubr.msk.bf16.gmra.mrb[24].mxu1 %vm788_vm1, %v7152_v32  ;;  %v7216_v32 = vld [vmem:[%s7497_s9 + $0x368] sm:$0xff]  }
  0x50   : > { %6570 = vmatmul.mubr.msk.bf16.gmra.mrb[24].mxu0 %vm788_vm1, %v7153_v33  ;;  %6443 = vmatprep.mubr.msk.bf16.mxu1 %vm788_vm1, %v7154_v34  ;;  %v7217_v33 = vld [vmem:[%s7497_s9 + $0x468] sm:$0xff]   ;;  %v7218_v34 = vld [vmem:[%s7497_s9 + $0x370] sm:$0xff]  }
  0x51   : > { %6573 = vmatprep.mubr.msk.bf16.mxu0 %vm788_vm1, %v7155_v35  ;;  %v7219_v35 = vld [vmem:[%s7497_s9 + $0x470] sm:$0xff]  }
  0x57   : > { %6444 = vmatmul.mubr.msk.bf16.gmra.mrb[28].mxu1 %vm788_vm1, %v7156_v36  ;;  %v7220_v36 = vld [vmem:[%s7497_s9 + $0x378] sm:$0xff]  }
  0x58   : > { %6574 = vmatmul.mubr.msk.bf16.gmra.mrb[28].mxu0 %vm788_vm1, %v7157_v37  ;;  %6447 = vmatprep.mubr.msk.bf16.mxu1 %vm788_vm1, %v7158_v38  ;;  %v7221_v37 = vld [vmem:[%s7497_s9 + $0x478] sm:$0xff]   ;;  %v7222_v38 = vld [vmem:[%s7497_s9 + $0x380] sm:$0xff]  }
  0x59   : > { %6577 = vmatprep.mubr.msk.bf16.mxu0 %vm788_vm1, %v7159_v39  ;;  %v7223_v39 = vld [vmem:[%s7497_s9 + $0x480] sm:$0xff]  }
  0x5f   : > { %6448 = vmatmul.mubr.msk.bf16.gmra.mrb[32].mxu1 %vm788_vm1, %v7160_v40  ;;  %v7224_v40 = vld [vmem:[%s7497_s9 + $0x388] sm:$0xff]  }
  0x60   : > { %6578 = vmatmul.mubr.msk.bf16.gmra.mrb[32].mxu0 %vm788_vm1, %v7161_v41  ;;  %6451 = vmatprep.mubr.msk.bf16.mxu1 %vm788_vm1, %v7162_v42  ;;  %v7225_v41 = vld [vmem:[%s7497_s9 + $0x488] sm:$0xff]   ;;  %v7226_v42 = vld [vmem:[%s7497_s9 + $0x390] sm:$0xff]  }
  0x61   : > { %6581 = vmatprep.mubr.msk.bf16.mxu0 %vm788_vm1, %v7163_v43  ;;  %v7227_v43 = vld [vmem:[%s7497_s9 + $0x490] sm:$0xff]  }
  0x67   : > { %6452 = vmatmul.mubr.msk.bf16.gmra.mrb[36].mxu1 %vm788_vm1, %v7164_v44  ;;  %v7228_v44 = vld [vmem:[%s7497_s9 + $0x398] sm:$0xff]  }
  0x68   : > { %6582 = vmatmul.mubr.msk.bf16.gmra.mrb[36].mxu0 %vm788_vm1, %v7165_v45  ;;  %6455 = vmatprep.mubr.msk.bf16.mxu1 %vm788_vm1, %v7166_v46  ;;  %v7229_v45 = vld [vmem:[%s7497_s9 + $0x498] sm:$0xff]   ;;  %v7230_v46 = vld [vmem:[%s7497_s9 + $0x3a0] sm:$0xff]  }
  0x69   : > { %6585 = vmatprep.mubr.msk.bf16.mxu0 %vm788_vm1, %v7167_v47  ;;  %v7231_v47 = vld [vmem:[%s7497_s9 + $0x4a0] sm:$0xff]  }
  0x6f   : > { %6456 = vmatmul.mubr.msk.bf16.gmra.mrb[40].mxu1 %vm788_vm1, %v7168_v48  ;;  %v7232_v48 = vld [vmem:[%s7497_s9 + $0x3a8] sm:$0xff]  }
  0x70   : > { %6586 = vmatmul.mubr.msk.bf16.gmra.mrb[40].mxu0 %vm788_vm1, %v7169_v49  ;;  %6459 = vmatprep.mubr.msk.bf16.mxu1 %vm788_vm1, %v7170_v50  ;;  %v7233_v49 = vld [vmem:[%s7497_s9 + $0x4a8] sm:$0xff]   ;;  %v7234_v50 = vld [vmem:[%s7497_s9 + $0x3b0] sm:$0xff]  }
  0x71   : > { %6589 = vmatprep.mubr.msk.bf16.mxu0 %vm788_vm1, %v7171_v51  ;;  %v7235_v51 = vld [vmem:[%s7497_s9 + $0x4b0] sm:$0xff]  }
  0x77   : > { %6460 = vmatmul.mubr.msk.bf16.gmra.mrb[44].mxu1 %vm788_vm1, %v7172_v52 }
  0x78   : > { %6590 = vmatmul.mubr.msk.bf16.gmra.mrb[44].mxu0 %vm788_vm1, %v7173_v53  ;;  %6463 = vmatprep.mubr.msk.bf16.mxu1 %vm788_vm1, %v7174_v54  ;;  %v7236_v54 = vld [vmem:[%s7497_s9 + $0x3b8] sm:$0xff]  }
  0x79   : > { %6593 = vmatprep.mubr.msk.bf16.mxu0 %vm788_vm1, %v7175_v55 }
  0x7f   : > { %6464 = vmatmul.mubr.msk.bf16.gmra.mrb[48].mxu1 %vm788_vm1, %v7176_v56  ;;  %v7237_v56 = vld [vmem:[%s7497_s9 + $0x4b8] sm:$0xff]  }
  0x80   : > { %6594 = vmatmul.mubr.msk.bf16.gmra.mrb[48].mxu0 %vm788_vm1, %v7177_v57  ;;  %6467 = vmatprep.mubr.msk.bf16.mxu1 %vm788_vm1, %v7178_v58  ;;  %v7238_v57 = vld [vmem:[%s7497_s9 + $0x3c0] sm:$0xff]  }
  0x81   : > { %6597 = vmatprep.mubr.msk.bf16.mxu0 %vm788_vm1, %v7179_v59  ;;  %v7239_v59 = vld [vmem:[%s7497_s9 + $0x4c0] sm:$0xff]  }
  0x87   : > { %6468 = vmatmul.mubr.msk.bf16.gmra.mrb[52].mxu1 %vm788_vm1, %v7180_v60 }
  0x88   : > { %6598 = vmatmul.mubr.msk.bf16.gmra.mrb[52].mxu0 %vm788_vm1, %v7181_v61  ;;  %6471 = vmatprep.mubr.msk.bf16.mxu1 %vm788_vm1, %v7182_v62  ;;  %v7240_v62 = vld [vmem:[%s7497_s9 + $0x3c8] sm:$0xff]  }
  0x89   : > { %6601 = vmatprep.mubr.msk.bf16.mxu0 %vm788_vm1, %v7183_v63 }
  0x8f   : > { %6472 = vmatmul.mubr.msk.bf16.gmra.mrb[56].mxu1 %vm788_vm1, %v7184_v0  ;;  %v7241_v0 = vld [vmem:[%s7497_s9 + $0x4c8] sm:$0xff]  }
  0x90   : > { %6602 = vmatmul.mubr.msk.bf16.gmra.mrb[56].mxu0 %vm788_vm1, %v7185_v1  ;;  %6475 = vmatprep.mubr.msk.bf16.mxu1 %vm788_vm1, %v7186_v2  ;;  %v7242_v1 = vld [vmem:[%s7497_s9 + $0x3d0] sm:$0xff]  }
  0x91   : > { %6605 = vmatprep.mubr.msk.bf16.mxu0 %vm788_vm1, %v7187_v3  ;;  %v7243_v3 = vld [vmem:[%s7497_s9 + $0x4d0] sm:$0xff]  }
  0x97   : > { %6476 = vmatmul.mubr.msk.bf16.gmra.mrb[60].mxu1 %vm788_vm1, %v7188_v4 }
  0x98   : > { %6606 = vmatmul.mubr.msk.bf16.gmra.mrb[60].mxu0 %vm788_vm1, %v7189_v5  ;;  %6479 = vmatprep.mubr.msk.bf16.mxu1 %vm788_vm1, %v7190_v6  ;;  %v7244_v6 = vld [vmem:[%s7497_s9 + $0x3d8] sm:$0xff]  }
  0x99   : > { %6675 = vmatprep.mubr.msk.bf16.mxu0 %vm788_vm1, %v7191_v7 }
  0x9f   : > { %6480 = vmatmul.mubr.msk.bf16.gmra.mrb[64].mxu1 %vm788_vm1, %v7192_v8  ;;  %v7245_v8 = vld [vmem:[%s7497_s9 + $0x4d8] sm:$0xff]  }
  0xa0   : > { %6676 = vmatmul.mubr.msk.bf16.vlgmr.msra.gmra.mrb[0].mxu0 %vm788_vm1, %v7193_v9  ;;  %6483 = vmatprep.mubr.msk.bf16.mxu1 %vm788_vm1, %v7194_v10  ;;  %v7246_v9 = vld [vmem:[%s7497_s9 + $0x3e0] sm:$0xff]  }
  0xa1   : > { %6679 = vmatprep.mubr.msk.bf16.mxu0 %vm788_vm1, %v7195_v11  ;;  %v7247_v11 = vld [vmem:[%s7497_s9 + $0x4e0] sm:$0xff]  }
  0xa7   : > { %6484 = vmatmul.mubr.msk.bf16.gmra.mrb[68].mxu1 %vm788_vm1, %v7196_v12 }
  0xa8   : > { %6680 = vmatmul.mubr.msk.bf16.gmra.mrb[4].mxu0 %vm788_vm1, %v7197_v13  ;;  %6487 = vmatprep.mubr.msk.bf16.mxu1 %vm788_vm1, %v7198_v14  ;;  %v7248_v14 = vld [vmem:[%s7497_s9 + $0x3e8] sm:$0xff]  }
  0xa9   : > { %6683 = vmatprep.mubr.msk.bf16.mxu0 %vm788_vm1, %v7199_v15 }
  0xaf   : > { %6488 = vmatmul.mubr.msk.bf16.gmra.mrb[72].mxu1 %vm788_vm1, %v7200_v16  ;;  %v7249_v16 = vld [vmem:[%s7497_s9 + $0x4e8] sm:$0xff]  }
  0xb0   : > { %6684 = vmatmul.mubr.msk.bf16.gmra.mrb[8].mxu0 %vm788_vm1, %v7201_v17  ;;  %6491 = vmatprep.mubr.msk.bf16.mxu1 %vm788_vm1, %v7202_v18  ;;  %v7250_v17 = vld [vmem:[%s7497_s9 + $0x3f0] sm:$0xff]  }
  0xb1   : > { %6687 = vmatprep.mubr.msk.bf16.mxu0 %vm788_vm1, %v7203_v19  ;;  %v7251_v19 = vld [vmem:[%s7497_s9 + $0x4f0] sm:$0xff]  }
  0xb7   : > { %6492 = vmatmul.mubr.msk.bf16.gmra.mrb[76].mxu1 %vm788_vm1, %v7204_v20 }
  0xb8   : > { %6688 = vmatmul.mubr.msk.bf16.gmra.mrb[12].mxu0 %vm788_vm1, %v7205_v21  ;;  %6495 = vmatprep.mubr.msk.bf16.mxu1 %vm788_vm1, %v7206_v22  ;;  %v7252_v22 = vld [vmem:[%s7497_s9 + $0x3f8] sm:$0xff]  }
  0xb9   : > { %6691 = vmatprep.mubr.msk.bf16.mxu0 %vm788_vm1, %v7207_v23 }
  0xbf   : > { %6496 = vmatmul.mubr.msk.bf16.gmra.mrb[80].mxu1 %vm788_vm1, %v7208_v24  ;;  %v7253_v24 = vld [vmem:[%s7497_s9 + $0x4f8] sm:$0xff]  }
  0xc0   : > { %6692 = vmatmul.mubr.msk.bf16.gmra.mrb[16].mxu0 %vm788_vm1, %v7209_v25  ;;  %6499 = vmatprep.mubr.msk.bf16.mxu1 %vm788_vm1, %v7210_v26  ;;  %v7254_v25 = vld [vmem:[%s7497_s9 + $0x100] sm:$0xff]  }
  0xc1   : > { %6695 = vmatprep.mubr.msk.bf16.mxu0 %vm788_vm1, %v7211_v27  ;;  %v7255_v27 = vld [vmem:[%s7497_s9 + $0x500] sm:$0xff]  }
  0xc7   : > { %6500 = vmatmul.mubr.msk.bf16.gmra.mrb[84].mxu1 %vm788_vm1, %v7212_v28 }
  0xc8   : > { %6696 = vmatmul.mubr.msk.bf16.gmra.mrb[20].mxu0 %vm788_vm1, %v7213_v29  ;;  %6503 = vmatprep.mubr.msk.bf16.mxu1 %vm788_vm1, %v7214_v30  ;;  %v7256_v30 = vld [vmem:[%s7497_s9 + $0x108] sm:$0xff]  }
  0xc9   : > { %6699 = vmatprep.mubr.msk.bf16.mxu0 %vm788_vm1, %v7215_v31 }
  0xcf   : > { %6504 = vmatmul.mubr.msk.bf16.gmra.mrb[88].mxu1 %vm788_vm1, %v7216_v32  ;;  %v7257_v32 = vld [vmem:[%s7497_s9 + $0x508] sm:$0xff]  }
  0xd0   : > { %6700 = vmatmul.mubr.msk.bf16.gmra.mrb[24].mxu0 %vm788_vm1, %v7217_v33  ;;  %6507 = vmatprep.mubr.msk.bf16.mxu1 %vm788_vm1, %v7218_v34  ;;  %v7258_v33 = vld [vmem:[%s7497_s9 + $0x110] sm:$0xff]  }
  0xd1   : > { %6703 = vmatprep.mubr.msk.bf16.mxu0 %vm788_vm1, %v7219_v35  ;;  %v7259_v35 = vld [vmem:[%s7497_s9 + $0x510] sm:$0xff]  }
  0xd7   : > { %6508 = vmatmul.mubr.msk.bf16.gmra.mrb[92].mxu1 %vm788_vm1, %v7220_v36 }
  0xd8   : > { %6704 = vmatmul.mubr.msk.bf16.gmra.mrb[28].mxu0 %vm788_vm1, %v7221_v37  ;;  %6511 = vmatprep.mubr.msk.bf16.mxu1 %vm788_vm1, %v7222_v38  ;;  %v7260_v38 = vld [vmem:[%s7497_s9 + $0x118] sm:$0xff]  }
  0xd9   : > { %6707 = vmatprep.mubr.msk.bf16.mxu0 %vm788_vm1, %v7223_v39 }
  0xdf   : > { %6512 = vmatmul.mubr.msk.bf16.gmra.mrb[96].mxu1 %vm788_vm1, %v7224_v40  ;;  %v7261_v40 = vld [vmem:[%s7497_s9 + $0x518] sm:$0xff]  }
  0xe0   : > { %6708 = vmatmul.mubr.msk.bf16.gmra.mrb[32].mxu0 %vm788_vm1, %v7225_v41  ;;  %6515 = vmatprep.mubr.msk.bf16.mxu1 %vm788_vm1, %v7226_v42  ;;  %v7262_v41 = vld [vmem:[%s7497_s9 + $0x120] sm:$0xff]  }
  0xe1   : > { %6711 = vmatprep.mubr.msk.bf16.mxu0 %vm788_vm1, %v7227_v43  ;;  %v7263_v43 = vld [vmem:[%s7497_s9 + $0x520] sm:$0xff]  }
  0xe7   : > { %6516 = vmatmul.mubr.msk.bf16.gmra.mrb[100].mxu1 %vm788_vm1, %v7228_v44 }
  0xe8   : > { %6712 = vmatmul.mubr.msk.bf16.gmra.mrb[36].mxu0 %vm788_vm1, %v7229_v45  ;;  %6519 = vmatprep.mubr.msk.bf16.mxu1 %vm788_vm1, %v7230_v46  ;;  %v7264_v46 = vld [vmem:[%s7497_s9 + $0x128] sm:$0xff]  }
  0xe9   : > { %6715 = vmatprep.mubr.msk.bf16.mxu0 %vm788_vm1, %v7231_v47 }
  0xef   : > { %6520 = vmatmul.mubr.msk.bf16.gmra.mrb[104].mxu1 %vm788_vm1, %v7232_v48  ;;  %v7265_v48 = vld [vmem:[%s7497_s9 + $0x528] sm:$0xff]  }
  0xf0   : > { %6716 = vmatmul.mubr.msk.bf16.gmra.mrb[40].mxu0 %vm788_vm1, %v7233_v49  ;;  %6523 = vmatprep.mubr.msk.bf16.mxu1 %vm788_vm1, %v7234_v50  ;;  %v7266_v49 = vld [vmem:[%s7497_s9 + $0x130] sm:$0xff]  }
  0xf1   : > { %6719 = vmatprep.mubr.msk.bf16.mxu0 %vm788_vm1, %v7235_v51  ;;  %v7267_v51 = vld [vmem:[%s7497_s9 + $0x530] sm:$0xff]  }
  0xf2   : > { %v7720_v52 = vpop.f32.mrb[0].mxu1 }
  0xf3   : > { %v7722_v53 = vpop.f32.mrb[1].mxu1 }
  0xf4   : > { %v7725_v55 = vpop.f32.mrb[2].mxu1 }
  0xf5   : > { %v7729_v58 = vpop.f32.mrb[3].mxu1 }
  0xf7   : > { %6524 = vmatmul.mubr.msk.bf16.gmra.mrb[108].mxu1 %vm788_vm1, %v7236_v54 }
  0xf8   : > { %6720 = vmatmul.mubr.msk.bf16.gmra.mrb[44].mxu0 %vm788_vm1, %v7237_v56  ;;  %6527 = vmatprep.mubr.msk.bf16.mxu1 %vm788_vm1, %v7238_v57  ;;  %v7268_v57 = vld [vmem:[%s7497_s9 + $0x138] sm:$0xff]  }
  0xf9   : > { %6723 = vmatprep.mubr.msk.bf16.mxu0 %vm788_vm1, %v7239_v59 }
  0xfa   : > { %v7736_v60 = vpop.f32.mrb[4].mxu1 }
  0xfb   : > { %v7738_v61 = vpop.f32.mrb[5].mxu1 }
  0xfc   : > { %v7741_v63 = vpop.f32.mrb[6].mxu1 }
  0xfd   : > { %v7745_v2 = vpop.f32.mrb[7].mxu1 }
  0xff   : > { %6528 = vmatmul.mubr.msk.bf16.gmra.mrb[112].mxu1 %vm788_vm1, %v7240_v62  ;;  %v7269_v62 = vld [vmem:[%s7497_s9 + $0x538] sm:$0xff]  }
 0x100   : > { %6724 = vmatmul.mubr.msk.bf16.gmra.mrb[48].mxu0 %vm788_vm1, %v7241_v0  ;;  %6531 = vmatprep.mubr.msk.bf16.mxu1 %vm788_vm1, %v7242_v1  ;;  %v7270_v0 = vld [vmem:[%s7497_s9 + $0x140] sm:$0xff]  }
 0x101   : > { %6727 = vmatprep.mubr.msk.bf16.mxu0 %vm788_vm1, %v7243_v3  ;;  %v7271_v3 = vld [vmem:[%s7497_s9 + $0x540] sm:$0xff]  }
 0x102   : > { %v7752_v4 = vpop.f32.mrb[8].mxu1 }
 0x103   : > { %v7754_v5 = vpop.f32.mrb[9].mxu1 }
 0x104   : > { %v7757_v7 = vpop.f32.mrb[10].mxu1 }
 0x105   : > { %v7761_v10 = vpop.f32.mrb[11].mxu1 }
 0x107   : > { %6532 = vmatmul.mubr.msk.bf16.gmra.mrb[116].mxu1 %vm788_vm1, %v7244_v6 }
 0x108   : > { %6728 = vmatmul.mubr.msk.bf16.gmra.mrb[52].mxu0 %vm788_vm1, %v7245_v8  ;;  %6535 = vmatprep.mubr.msk.bf16.mxu1 %vm788_vm1, %v7246_v9  ;;  %v7272_v9 = vld [vmem:[%s7497_s9 + $0x148] sm:$0xff]  }
 0x109   : > { %6731 = vmatprep.mubr.msk.bf16.mxu0 %vm788_vm1, %v7247_v11 }
 0x10a   : > { %v7768_v12 = vpop.f32.mrb[12].mxu1 }
 0x10b   : > { %v7770_v13 = vpop.f32.mrb[13].mxu1 }
 0x10c   : > { %v7773_v15 = vpop.f32.mrb[14].mxu1 }
 0x10d   : > { %v7777_v18 = vpop.f32.mrb[15].mxu1 }
 0x10f   : > { %6536 = vmatmul.mubr.msk.bf16.gmra.mrb[120].mxu1 %vm788_vm1, %v7248_v14  ;;  %v7273_v14 = vld [vmem:[%s7497_s9 + $0x548] sm:$0xff]  }
 0x110   : > { %6732 = vmatmul.mubr.msk.bf16.gmra.mrb[56].mxu0 %vm788_vm1, %v7249_v16  ;;  %6539 = vmatprep.mubr.msk.bf16.mxu1 %vm788_vm1, %v7250_v17  ;;  %v7274_v16 = vld [vmem:[%s7497_s9 + $0x150] sm:$0xff]  }
 0x111   : > { %6735 = vmatprep.mubr.msk.bf16.mxu0 %vm788_vm1, %v7251_v19  ;;  %v7275_v19 = vld [vmem:[%s7497_s9 + $0x550] sm:$0xff]  }
 0x112   : > { %v7784_v20 = vpop.f32.mrb[16].mxu1 }
 0x113   : > { %v7786_v21 = vpop.f32.mrb[17].mxu1 }
 0x114   : > { %v7789_v23 = vpop.f32.mrb[18].mxu1 }
 0x115   : > { %v7793_v26 = vpop.f32.mrb[19].mxu1 }
 0x117   : > { %6540 = vmatmul.mubr.msk.bf16.gmra.mrb[124].mxu1 %vm788_vm1, %v7252_v22 }
 0x118   : > { %6736 = vmatmul.mubr.msk.bf16.gmra.mrb[60].mxu0 %vm788_vm1, %v7253_v24  ;;  %6609 = vmatprep.mubr.msk.bf16.mxu1 %vm788_vm1, %v7254_v25  ;;  %v7276_v25 = vld [vmem:[%s7497_s9 + $0x158] sm:$0xff]  }
 0x119   : > { %6739 = vmatprep.mubr.msk.bf16.mxu0 %vm788_vm1, %v7255_v27 }
 0x11a   : > { %v7800_v28 = vpop.f32.mrb[20].mxu1 }
 0x11b   : > { %v7802_v29 = vpop.f32.mrb[21].mxu1 }
 0x11c   : > { %v7805_v31 = vpop.f32.mrb[22].mxu1 }
 0x11d   : > { %v7809_v34 = vpop.f32.mrb[23].mxu1 }
 0x11f   : > { %6610 = vmatmul.mubr.msk.bf16.vlgmr.msra.gmra.mrb[64].mxu1 %vm788_vm1, %v7256_v30  ;;  %v7277_v30 = vld [vmem:[%s7497_s9 + $0x558] sm:$0xff]  }
 0x120   : > { %6740 = vmatmul.mubr.msk.bf16.gmra.mrb[64].mxu0 %vm788_vm1, %v7257_v32  ;;  %6613 = vmatprep.mubr.msk.bf16.mxu1 %vm788_vm1, %v7258_v33  ;;  %v7278_v32 = vld [vmem:[%s7497_s9 + $0x160] sm:$0xff]  }
 0x121   : > { %6743 = vmatprep.mubr.msk.bf16.mxu0 %vm788_vm1, %v7259_v35  ;;  %v7279_v35 = vld [vmem:[%s7497_s9 + $0x560] sm:$0xff]  }
 0x122   : > { %v7816_v36 = vpop.f32.mrb[24].mxu1 }
 0x123   : > { %v7818_v37 = vpop.f32.mrb[25].mxu1 }
 0x124   : > { %v7821_v39 = vpop.f32.mrb[26].mxu1 }
 0x125   : > { %v7825_v42 = vpop.f32.mrb[27].mxu1 }
 0x127   : > { %6614 = vmatmul.mubr.msk.bf16.gmra.mrb[68].mxu1 %vm788_vm1, %v7260_v38 }
 0x128   : > { %6744 = vmatmul.mubr.msk.bf16.gmra.mrb[68].mxu0 %vm788_vm1, %v7261_v40  ;;  %6617 = vmatprep.mubr.msk.bf16.mxu1 %vm788_vm1, %v7262_v41  ;;  %v7280_v41 = vld [vmem:[%s7497_s9 + $0x168] sm:$0xff]  }
 0x129   : > { %6747 = vmatprep.mubr.msk.bf16.mxu0 %vm788_vm1, %v7263_v43 }
 0x12a   : > { %v7832_v44 = vpop.f32.mrb[28].mxu1 }
 0x12b   : > { %v7834_v45 = vpop.f32.mrb[29].mxu1 }
 0x12c   : > { %v7837_v47 = vpop.f32.mrb[30].mxu1 }
 0x12d   : > { %v7841_v50 = vpop.f32.mrb[31].mxu1 }
 0x12f   : > { %6618 = vmatmul.mubr.msk.bf16.gmra.mrb[72].mxu1 %vm788_vm1, %v7264_v46  ;;  %v7281_v46 = vld [vmem:[%s7497_s9 + $0x568] sm:$0xff]  }
 0x130   : > { %6748 = vmatmul.mubr.msk.bf16.gmra.mrb[72].mxu0 %vm788_vm1, %v7265_v48  ;;  %6621 = vmatprep.mubr.msk.bf16.mxu1 %vm788_vm1, %v7266_v49  ;;  %v7282_v48 = vld [vmem:[%s7497_s9 + $0x170] sm:$0xff]  }
 0x131   : > { %6751 = vmatprep.mubr.msk.bf16.mxu0 %vm788_vm1, %v7267_v51  ;;  %v7283_v51 = vld [vmem:[%s7497_s9 + $0x570] sm:$0xff]  }
 0x132   : > { %v7848_v54 = vpop.f32.mrb[32].mxu1 }
 0x133   : > { %v7850_v56 = vpop.f32.mrb[33].mxu1 }
 0x134   : > { %v7853_v59 = vpop.f32.mrb[34].mxu1 }
 0x135   : > { %v7857_v1 = vpop.f32.mrb[35].mxu1 }
 0x137   : > { %6622 = vmatmul.mubr.msk.bf16.gmra.mrb[76].mxu1 %vm788_vm1, %v7268_v57 }
 0x138   : > { %6752 = vmatmul.mubr.msk.bf16.gmra.mrb[76].mxu0 %vm788_vm1, %v7269_v62  ;;  %6625 = vmatprep.mubr.msk.bf16.mxu1 %vm788_vm1, %v7270_v0  ;;  %v7284_v0 = vld [vmem:[%s7497_s9 + $0x178] sm:$0xff]  }
 0x139   : > { %6755 = vmatprep.mubr.msk.bf16.mxu0 %vm788_vm1, %v7271_v3 }
 0x13a   : > { %v7864_v6 = vpop.f32.mrb[36].mxu1 }
 0x13b   : > { %v7866_v8 = vpop.f32.mrb[37].mxu1 }
 0x13c   : > { %v7869_v11 = vpop.f32.mrb[38].mxu1 }
 0x13d   : > { %v7873_v17 = vpop.f32.mrb[39].mxu1 }
 0x13f   : > { %6626 = vmatmul.mubr.msk.bf16.gmra.mrb[80].mxu1 %vm788_vm1, %v7272_v9  ;;  %v7285_v9 = vld [vmem:[%s7497_s9 + $0x578] sm:$0xff]  }
 0x140   : > { %6756 = vmatmul.mubr.msk.bf16.gmra.mrb[80].mxu0 %vm788_vm1, %v7273_v14  ;;  %6629 = vmatprep.mubr.msk.bf16.mxu1 %vm788_vm1, %v7274_v16  ;;  %v7286_v14 = vld [vmem:[%s7497_s9 + $0x180] sm:$0xff]  }
 0x141   : > { %6759 = vmatprep.mubr.msk.bf16.mxu0 %vm788_vm1, %v7275_v19  ;;  %v7287_v19 = vld [vmem:[%s7497_s9 + $0x580] sm:$0xff]  }
 0x142   : > { %v7880_v22 = vpop.f32.mrb[40].mxu1 }
 0x143   : > { %v7882_v24 = vpop.f32.mrb[41].mxu1 }
 0x144   : > { %v7885_v27 = vpop.f32.mrb[42].mxu1 }
 0x145   : > { %v7889_v33 = vpop.f32.mrb[43].mxu1 }
 0x147   : > { %6630 = vmatmul.mubr.msk.bf16.gmra.mrb[84].mxu1 %vm788_vm1, %v7276_v25 }
 0x148   : > { %6760 = vmatmul.mubr.msk.bf16.gmra.mrb[84].mxu0 %vm788_vm1, %v7277_v30  ;;  %6633 = vmatprep.mubr.msk.bf16.mxu1 %vm788_vm1, %v7278_v32  ;;  %v7288_v32 = vld [vmem:[%s7497_s9 + $0x188] sm:$0xff]  }
 0x149   : > { %6763 = vmatprep.mubr.msk.bf16.mxu0 %vm788_vm1, %v7279_v35 }
 0x14a   : > { %v7896_v38 = vpop.f32.mrb[44].mxu1 }
 0x14b   : > { %v7898_v40 = vpop.f32.mrb[45].mxu1 }
 0x14c   : > { %v7901_v43 = vpop.f32.mrb[46].mxu1 }
 0x14d   : > { %v7905_v49 = vpop.f32.mrb[47].mxu1 }
 0x14e   : > { %8346 = vst [vmem:[#allocation5_spill] sm:$0xff] %v7905_v49 }
 0x14f   : > { %6634 = vmatmul.mubr.msk.bf16.gmra.mrb[88].mxu1 %vm788_vm1, %v7280_v41  ;;  %v7289_v41 = vld [vmem:[%s7497_s9 + $0x588] sm:$0xff]  }
 0x150   : > { %6764 = vmatmul.mubr.msk.bf16.gmra.mrb[88].mxu0 %vm788_vm1, %v7281_v46  ;;  %6637 = vmatprep.mubr.msk.bf16.mxu1 %vm788_vm1, %v7282_v48  ;;  %v7290_v46 = vld [vmem:[%s7497_s9 + $0x190] sm:$0xff]  }
 0x151   : > { %6767 = vmatprep.mubr.msk.bf16.mxu0 %vm788_vm1, %v7283_v51  ;;  %v7291_v51 = vld [vmem:[%s7497_s9 + $0x590] sm:$0xff]  }
 0x152   : > { %v7912_v57 = vpop.f32.mrb[48].mxu1 }
 0x153   : > { %8347 = vst [vmem:[#allocation6_spill] sm:$0xff] %v7912_v57  ;;  %v7914_v62 = vpop.f32.mrb[49].mxu1  ;;  %v7306_v57 = vld [vmem:[%s7497_s9 + $0x1d0] sm:$0xff]  }
 0x154   : > { %8348 = vst [vmem:[#allocation7_spill] sm:$0xff] %v7914_v62  ;;  %v7917_v3 = vpop.f32.mrb[50].mxu1 }
 0x155   : > { %8349 = vst [vmem:[#allocation8_spill] sm:$0xff] %v7917_v3  ;;  %v7921_v16 = vpop.f32.mrb[51].mxu1 }
 0x156   : > { %8350 = vst [vmem:[#allocation9_spill] sm:$0xff] %v7921_v16 }
 0x157   : > { %6638 = vmatmul.mubr.msk.bf16.gmra.mrb[92].mxu1 %vm788_vm1, %v7284_v0 }
 0x158   : > { %6768 = vmatmul.mubr.msk.bf16.gmra.mrb[92].mxu0 %vm788_vm1, %v7285_v9  ;;  %6641 = vmatprep.mubr.msk.bf16.mxu1 %vm788_vm1, %v7286_v14  ;;  %v7292_v14 = vld [vmem:[%s7497_s9 + $0x198] sm:$0xff]  }
 0x159   : > { %6771 = vmatprep.mubr.msk.bf16.mxu0 %vm788_vm1, %v7287_v19 }
 0x15a   : > { %v7928_v25 = vpop.f32.mrb[52].mxu1 }
 0x15b   : > { %8351 = vst [vmem:[#allocation10_spill] sm:$0xff] %v7928_v25  ;;  %v7930_v30 = vpop.f32.mrb[53].mxu1 }
 0x15c   : > { %8352 = vst [vmem:[#allocation11_spill] sm:$0xff] %v7930_v30  ;;  %v7933_v35 = vpop.f32.mrb[54].mxu1  ;;  %v7302_v30 = vld [vmem:[%s7497_s9 + $0x1c0] sm:$0xff]  }
 0x15d   : > { %8353 = vst [vmem:[#allocation12_spill] sm:$0xff] %v7933_v35  ;;  %v7937_v48 = vpop.f32.mrb[55].mxu1  ;;  %v7294_v35 = vld [vmem:[%s7497_s9 + $0x1a0] sm:$0xff]  }
 0x15e   : > { %8354 = vst [vmem:[#allocation13_spill] sm:$0xff] %v7937_v48  ;;  %v7293_v48 = vld [vmem:[%s7497_s9 + $0x598] sm:$0xff]  }
 0x15f   : > { %6642 = vmatmul.mubr.msk.bf16.gmra.mrb[96].mxu1 %vm788_vm1, %v7288_v32 }
 0x160   : > { %6772 = vmatmul.mubr.msk.bf16.gmra.mrb[96].mxu0 %vm788_vm1, %v7289_v41  ;;  %6645 = vmatprep.mubr.msk.bf16.mxu1 %vm788_vm1, %v7290_v46  ;;  %v7295_v41 = vld [vmem:[%s7497_s9 + $0x5a0] sm:$0xff]  }
 0x161   : > { %6775 = vmatprep.mubr.msk.bf16.mxu0 %vm788_vm1, %v7291_v51 }
 0x162   : > { %v7944_v0 = vpop.f32.mrb[56].mxu1 }
 0x163   : > { %8355 = vst [vmem:[#allocation14_spill] sm:$0xff] %v7944_v0  ;;  %v7946_v9 = vpop.f32.mrb[57].mxu1  ;;  %v7298_v0 = vld [vmem:[%s7497_s9 + $0x1b0] sm:$0xff]  }
 0x164   : > { %8356 = vst [vmem:[#allocation15_spill] sm:$0xff] %v7946_v9  ;;  %v7949_v19 = vpop.f32.mrb[58].mxu1 }
 0x165   : > { %8357 = vst [vmem:[#allocation16_spill] sm:$0xff] %v7949_v19  ;;  %v7953_v32 = vpop.f32.mrb[59].mxu1  ;;  %v7296_v19 = vld [vmem:[%s7497_s9 + $0x1a8] sm:$0xff]  }
 0x166   : > { %8358 = vst [vmem:[#allocation17_spill] sm:$0xff] %v7953_v32  ;;  %v7297_v32 = vld [vmem:[%s7497_s9 + $0x5a8] sm:$0xff]  }
 0x167   : > { %6646 = vmatmul.mubr.msk.bf16.gmra.mrb[100].mxu1 %vm788_vm1, %v7292_v14 }
 0x168   : > { %6776 = vmatmul.mubr.msk.bf16.gmra.mrb[100].mxu0 %vm788_vm1, %v7293_v48  ;;  %6649 = vmatprep.mubr.msk.bf16.mxu1 %vm788_vm1, %v7294_v35  ;;  %v7299_v48 = vld [vmem:[%s7497_s9 + $0x5b0] sm:$0xff]  }
 0x169   : > { %6779 = vmatprep.mubr.msk.bf16.mxu0 %vm788_vm1, %v7295_v41  ;;  %v7979_v41 = vld [vmem:[%s8342_s2] ss:$0 sm:$0xff] }
 0x16a   : > { %v7960_v46 = vpop.f32.mrb[60].mxu1 }
 0x16b   : > { %8359 = vst [vmem:[#allocation18_spill] sm:$0xff] %v7960_v46  ;;  %v7962_v51 = vpop.f32.mrb[61].mxu1  ;;  %v7301_v46 = vld [vmem:[%s7497_s9 + $0x5b8] sm:$0xff]  }
 0x16c   : > { %8360 = vst [vmem:[#allocation19_spill] sm:$0xff] %v7962_v51  ;;  %v7965_v9 = vpop.f32.mrb[62].mxu1 }
 0x16d   : > { %8361 = vst [vmem:[#allocation20_spill] sm:$0xff] %v7965_v9  ;;  %v7969_v14 = vpop.f32.mrb[63].mxu1  ;;  %v7300_v9 = vld [vmem:[%s7497_s9 + $0x1b8] sm:$0xff]  }
 0x16e   : > { %8362 = vst [vmem:[#allocation21_spill] sm:$0xff] %v7969_v14 }
 0x16f   : > { %6650 = vmatmul.mubr.msk.bf16.gmra.mrb[104].mxu1 %vm788_vm1, %v7296_v19 }
 0x170   : > { %6780 = vmatmul.mubr.msk.bf16.gmra.mrb[104].mxu0 %vm788_vm1, %v7297_v32  ;;  %6653 = vmatprep.mubr.msk.bf16.mxu1 %vm788_vm1, %v7298_v0  ;;  %v7303_v0 = vld [vmem:[%s7497_s9 + $0x5c0] sm:$0xff]  }
 0x171   : > { %6783 = vmatprep.mubr.msk.bf16.mxu0 %vm788_vm1, %v7299_v48 }
 0x173   : > { %v6677_v35 = vpop.f32.mrb[0].mxu0 }
 0x174   : > { %v6805_v14 = vadd.f32 %v6677_v35, %v7720_v52  ;;  %v3281_v51 = vpop.f32.mrb[1].mxu0 }
 0x175   : > { %v6806_v19 = vadd.f32 %v3281_v51, %v7722_v53  ;;  %v6678_v32 = vpop.f32.mrb[2].mxu0 }
 0x176   : > { %v3929_v48 = vadd.f32 %v6805_v14, %v7979_v41  ;;  %v6807_v25 = vadd.f32 %v6678_v32, %v7725_v55  ;;  %v3284_v16 = vpop.f32.mrb[3].mxu0  ;;  %v7304_v14 = vld [vmem:[%s7497_s9 + $0x1c8] sm:$0xff]  }
 0x177   : > { %v3927_v3 = vadd.f32 %v6806_v19, %v7979_v41  ;;  %v6808_v62 = vadd.f32 %v3284_v16, %v7729_v58  ;;  %6654 = vmatmul.mubr.msk.bf16.gmra.mrb[108].mxu1 %vm788_vm1, %v7300_v9 }
 0x178   : > { %v3930_v52 = vadd.f32 %v6807_v25, %v7979_v41  ;;  %6784 = vmatmul.mubr.msk.bf16.gmra.mrb[108].mxu0 %vm788_vm1, %v7301_v46  ;;  %6657 = vmatprep.mubr.msk.bf16.mxu1 %vm788_vm1, %v7302_v30  ;;  %v4057_v55 = vmax.f32 %v3929_v48, 0.0  ;;  %v7305_v25 = vld [vmem:[%s7497_s9 + $0x5c8] sm:$0xff]  }
 0x179   : > { %v3928_v53 = vadd.f32 %v6808_v62, %v7979_v41  ;;  %6787 = vmatprep.mubr.msk.bf16.mxu0 %vm788_vm1, %v7303_v0  ;;  %v4055_v58 = vmax.f32 %v3927_v3, 0.0  ;;  %v7307_v62 = vld [vmem:[%s7497_s9 + $0x5d0] sm:$0xff]  }
 0x17a   : > { %v4058_v51 = vmax.f32 %v3930_v52, 0.0 }
 0x17b   : > { %v4056_v16 = vmax.f32 %v3928_v53, 0.0  ;;  %v6681_v9 = vpop.f32.mrb[4].mxu0 }
 0x17c   : > { %v5843_v35 = vpack.c.bf16 %v4058_v51, %v4057_v55  ;;  %v6809_v19 = vadd.f32 %v6681_v9, %v7736_v60  ;;  %v3297_v32 = vpop.f32.mrb[5].mxu0 }
 0x17d   : > { %v5838_v46 = vpack.c.bf16 %v4056_v16, %v4055_v58  ;;  %v6810_v30 = vadd.f32 %v3297_v32, %v7738_v61  ;;  %v6682_v49 = vpop.f32.mrb[6].mxu0  ;;  %v7308_v58 = vld [vmem:[%s7497_s9 + $0x1d8] sm:$0xff]  }
 0x17e   : > { %6155 = vst [vmem:[%s8006_s21 + $0x8] sm:$0xff] %v5843_v35   ;;  %v3933_v3 = vadd.f32 %v6809_v19, %v7979_v41  ;;  %v6811_v0 = vadd.f32 %v6682_v49, %v7741_v63  ;;  %v3300_v48 = vpop.f32.mrb[7].mxu0  ;;  %v7309_v35 = vld [vmem:[%s7497_s9 + $0x5d8] sm:$0xff]   ;;  %v7310_v19 = vld [vmem:[%s7497_s9 + $0x1e0] sm:$0xff]  }
 0x17f   : > { %5839 = vst [vmem:[%s8006_s21] sm:$0xff] %v5838_v46   ;;  %v3931_v60 = vadd.f32 %v6810_v30, %v7979_v41  ;;  %v6812_v52 = vadd.f32 %v3300_v48, %v7745_v2  ;;  %6658 = vmatmul.mubr.msk.bf16.gmra.mrb[112].mxu1 %vm788_vm1, %v7304_v14  ;;  %v7311_v46 = vld [vmem:[%s7497_s9 + $0x5e0] sm:$0xff]  }
 0x180   : > { %v3934_v61 = vadd.f32 %v6811_v0, %v7979_v41  ;;  %6788 = vmatmul.mubr.msk.bf16.gmra.mrb[112].mxu0 %vm788_vm1, %v7305_v25  ;;  %6661 = vmatprep.mubr.msk.bf16.mxu1 %vm788_vm1, %v7306_v57  ;;  %v4061_v63 = vmax.f32 %v3933_v3, 0.0 }
 0x181   : > { %v3932_v53 = vadd.f32 %v6812_v52, %v7979_v41  ;;  %6791 = vmatprep.mubr.msk.bf16.mxu0 %vm788_vm1, %v7307_v62  ;;  %v4059_v55 = vmax.f32 %v3931_v60, 0.0 }
 0x182   : > { %v4062_v49 = vmax.f32 %v3934_v61, 0.0 }
 0x183   : > { %v4060_v2 = vmax.f32 %v3932_v53, 0.0  ;;  %v6685_v51 = vpop.f32.mrb[8].mxu0  ;;  %v7312_v53 = vld [vmem:[%s7497_s9 + $0x1e8] sm:$0xff]  }
 0x184   : > { %v5853_v16 = vpack.c.bf16 %v4062_v49, %v4061_v63  ;;  %v6813_v9 = vadd.f32 %v6685_v51, %v7752_v4  ;;  %v3313_v14 = vpop.f32.mrb[9].mxu0  ;;  %v7314_v51 = vld [vmem:[%s7497_s9 + $0x1f0] sm:$0xff]  }
 0x185   : > { %v5848_v57 = vpack.c.bf16 %v4060_v2, %v4059_v55  ;;  %v6814_v32 = vadd.f32 %v3313_v14, %v7754_v5  ;;  %v6686_v25 = vpop.f32.mrb[10].mxu0  ;;  %v7313_v2 = vld [vmem:[%s7497_s9 + $0x5e8] sm:$0xff]   ;;  %v7315_v14 = vld [vmem:[%s7497_s9 + $0x5f0] sm:$0xff]  }
 0x186   : > { %6157 = vst [vmem:[%s8006_s21 + $0x18] sm:$0xff] %v5853_v16   ;;  %v3937_v30 = vadd.f32 %v6813_v9, %v7979_v41  ;;  %v6815_v62 = vadd.f32 %v6686_v25, %v7757_v7  ;;  %v3316_v3 = vpop.f32.mrb[11].mxu0 }
 0x187   : > { %6156 = vst [vmem:[%s8006_s21 + $0x10] sm:$0xff] %v5848_v57   ;;  %v3935_v0 = vadd.f32 %v6814_v32, %v7979_v41  ;;  %v6816_v4 = vadd.f32 %v3316_v3, %v7761_v10  ;;  %6662 = vmatmul.mubr.msk.bf16.gmra.mrb[116].mxu1 %vm788_vm1, %v7308_v58  ;;  %v7316_v3 = vld [vmem:[%s7497_s9 + $0x1f8] sm:$0xff]  }
 0x188   : > { %v3938_v5 = vadd.f32 %v6815_v62, %v7979_v41  ;;  %6792 = vmatmul.mubr.msk.bf16.gmra.mrb[116].mxu0 %vm788_vm1, %v7309_v35  ;;  %6665 = vmatprep.mubr.msk.bf16.mxu1 %vm788_vm1, %v7310_v19  ;;  %v4065_v7 = vmax.f32 %v3937_v30, 0.0 }
 0x189   : > { %v3936_v48 = vadd.f32 %v6816_v4, %v7979_v41  ;;  %6795 = vmatprep.mubr.msk.bf16.mxu0 %vm788_vm1, %v7311_v46  ;;  %v4063_v52 = vmax.f32 %v3935_v0, 0.0 }
 0x18a   : > { %v4066_v60 = vmax.f32 %v3938_v5, 0.0 }
 0x18b   : > { %v4064_v10 = vmax.f32 %v3936_v48, 0.0  ;;  %v6689_v61 = vpop.f32.mrb[12].mxu0  ;;  %v7317_v48 = vld [vmem:[%s7497_s9 + $0x5f8] sm:$0xff]  }
 0x18c   : > { %v5863_v63 = vpack.c.bf16 %v4066_v60, %v4065_v7  ;;  %v6817_v49 = vadd.f32 %v6689_v61, %v7768_v12  ;;  %v3329_v55 = vpop.f32.mrb[13].mxu0 }
 0x18d   : > { %v5858_v58 = vpack.c.bf16 %v4064_v10, %v4063_v52  ;;  %v6818_v16 = vadd.f32 %v3329_v55, %v7770_v13  ;;  %v6690_v9 = vpop.f32.mrb[14].mxu0 }
 0x18e   : > { %6159 = vst [vmem:[%s8006_s21 + $0x28] sm:$0xff] %v5863_v63   ;;  %v3941_v35 = vadd.f32 %v6817_v49, %v7979_v41  ;;  %v6819_v19 = vadd.f32 %v6690_v9, %v7773_v15  ;;  %v3332_v57 = vpop.f32.mrb[15].mxu0 }
 0x18f   : > { %6158 = vst [vmem:[%s8006_s21 + $0x20] sm:$0xff] %v5858_v58   ;;  %v3939_v32 = vadd.f32 %v6818_v16, %v7979_v41  ;;  %v6820_v12 = vadd.f32 %v3332_v57, %v7777_v18  ;;  %6666 = vmatmul.mubr.msk.bf16.gmra.mrb[120].mxu1 %vm788_vm1, %v7312_v53 }
 0x190   : > { %v3942_v25 = vadd.f32 %v6819_v19, %v7979_v41  ;;  %6796 = vmatmul.mubr.msk.bf16.gmra.mrb[120].mxu0 %vm788_vm1, %v7313_v2  ;;  %6669 = vmatprep.mubr.msk.bf16.mxu1 %vm788_vm1, %v7314_v51  ;;  %v4069_v15 = vmax.f32 %v3941_v35, 0.0 }
 0x191   : > { %v3940_v13 = vadd.f32 %v6820_v12, %v7979_v41  ;;  %6799 = vmatprep.mubr.msk.bf16.mxu0 %vm788_vm1, %v7315_v14  ;;  %v4067_v30 = vmax.f32 %v3939_v32, 0.0 }
 0x192   : > { %v4070_v46 = vmax.f32 %v3942_v25, 0.0 }
 0x193   : > { %v4068_v62 = vmax.f32 %v3940_v13, 0.0  ;;  %v6693_v18 = vpop.f32.mrb[16].mxu0 }
 0x194   : > { %v5873_v0 = vpack.c.bf16 %v4070_v46, %v4069_v15  ;;  %v6821_v4 = vadd.f32 %v6693_v18, %v7784_v20  ;;  %v3345_v5 = vpop.f32.mrb[17].mxu0 }
 0x195   : > { %v5868_v7 = vpack.c.bf16 %v4068_v62, %v4067_v30  ;;  %v6822_v60 = vadd.f32 %v3345_v5, %v7786_v21  ;;  %v6694_v52 = vpop.f32.mrb[18].mxu0 }
 0x196   : > { %6161 = vst [vmem:[%s8006_s21 + $0x38] sm:$0xff] %v5873_v0   ;;  %v3945_v10 = vadd.f32 %v6821_v4, %v7979_v41  ;;  %v6823_v61 = vadd.f32 %v6694_v52, %v7789_v23  ;;  %v3348_v53 = vpop.f32.mrb[19].mxu0 }
 0x197   : > { %6160 = vst [vmem:[%s8006_s21 + $0x30] sm:$0xff] %v5868_v7   ;;  %v3943_v63 = vadd.f32 %v6822_v60, %v7979_v41  ;;  %v6824_v49 = vadd.f32 %v3348_v53, %v7793_v26  ;;  %6670 = vmatmul.mubr.msk.bf16.gmra.mrb[124].mxu1 %vm788_vm1, %v7316_v3 }
 0x198   : > { %v3946_v20 = vadd.f32 %v6823_v61, %v7979_v41  ;;  %6800 = vmatmul.mubr.msk.bf16.gmra.mrb[124].mxu0 %vm788_vm1, %v7317_v48  ;;  %v4073_v55 = vmax.f32 %v3945_v10, 0.0 }
 0x199   : > { %v3944_v21 = vadd.f32 %v6824_v49, %v7979_v41  ;;  %v4071_v51 = vmax.f32 %v3943_v63, 0.0 }
 0x19a   : > { %v4074_v2 = vmax.f32 %v3946_v20, 0.0 }
 0x19b   : > { %v4072_v23 = vmax.f32 %v3944_v21, 0.0  ;;  %v6697_v58 = vpop.f32.mrb[20].mxu0 }
 0x19c   : > { %v5883_v16 = vpack.c.bf16 %v4074_v2, %v4073_v55  ;;  %v6825_v9 = vadd.f32 %v6697_v58, %v7800_v28  ;;  %v3361_v14 = vpop.f32.mrb[21].mxu0 }
 0x19d   : > { %v5878_v26 = vpack.c.bf16 %v4072_v23, %v4071_v51  ;;  %v6826_v35 = vadd.f32 %v3361_v14, %v7802_v29  ;;  %v6698_v19 = vpop.f32.mrb[22].mxu0 }
 0x19e   : > { %6163 = vst [vmem:[%s8006_s21 + $0x48] sm:$0xff] %v5883_v16   ;;  %v3949_v57 = vadd.f32 %v6825_v9, %v7979_v41  ;;  %v6827_v32 = vadd.f32 %v6698_v19, %v7805_v31  ;;  %v3364_v12 = vpop.f32.mrb[23].mxu0 }
 0x19f   : > { %6162 = vst [vmem:[%s8006_s21 + $0x40] sm:$0xff] %v5878_v26   ;;  %v3947_v25 = vadd.f32 %v6826_v35, %v7979_v41  ;;  %v6828_v13 = vadd.f32 %v3364_v12, %v7809_v34 }
 0x1a0   : > { %v3950_v15 = vadd.f32 %v6827_v32, %v7979_v41  ;;  %v4077_v46 = vmax.f32 %v3949_v57, 0.0 }
 0x1a1   : > { %v3948_v28 = vadd.f32 %v6828_v13, %v7979_v41  ;;  %v4075_v30 = vmax.f32 %v3947_v25, 0.0 }
 0x1a2   : > { %v4078_v29 = vmax.f32 %v3950_v15, 0.0 }
 0x1a3   : > { %v4076_v62 = vmax.f32 %v3948_v28, 0.0  ;;  %v6701_v18 = vpop.f32.mrb[24].mxu0 }
 0x1a4   : > { %v5893_v3 = vpack.c.bf16 %v4078_v29, %v4077_v46  ;;  %v6829_v31 = vadd.f32 %v6701_v18, %v7816_v36  ;;  %v3377_v0 = vpop.f32.mrb[25].mxu0 }
 0x1a5   : > { %v5888_v4 = vpack.c.bf16 %v4076_v62, %v4075_v30  ;;  %v6830_v5 = vadd.f32 %v3377_v0, %v7818_v37  ;;  %v6702_v48 = vpop.f32.mrb[26].mxu0 }
 0x1a6   : > { %6165 = vst [vmem:[%s8006_s21 + $0x58] sm:$0xff] %v5893_v3   ;;  %v3953_v34 = vadd.f32 %v6829_v31, %v7979_v41  ;;  %v6831_v7 = vadd.f32 %v6702_v48, %v7821_v39  ;;  %v3380_v60 = vpop.f32.mrb[27].mxu0 }
 0x1a7   : > { %6164 = vst [vmem:[%s8006_s21 + $0x50] sm:$0xff] %v5888_v4   ;;  %v3951_v52 = vadd.f32 %v6830_v5, %v7979_v41  ;;  %v6832_v10 = vadd.f32 %v3380_v60, %v7825_v42 }
 0x1a8   : > { %v3954_v61 = vadd.f32 %v6831_v7, %v7979_v41  ;;  %v4081_v53 = vmax.f32 %v3953_v34, 0.0 }
 0x1a9   : > { %v3952_v36 = vadd.f32 %v6832_v10, %v7979_v41  ;;  %v4079_v63 = vmax.f32 %v3951_v52, 0.0 }
 0x1aa   : > { %v4082_v37 = vmax.f32 %v3954_v61, 0.0 }
 0x1ab   : > { %v4080_v49 = vmax.f32 %v3952_v36, 0.0  ;;  %v6705_v20 = vpop.f32.mrb[28].mxu0 }
 0x1ac   : > { %v5903_v21 = vpack.c.bf16 %v4082_v37, %v4081_v53  ;;  %v6833_v39 = vadd.f32 %v6705_v20, %v7832_v44  ;;  %v3393_v55 = vpop.f32.mrb[29].mxu0 }
 0x1ad   : > { %v5898_v2 = vpack.c.bf16 %v4080_v49, %v4079_v63  ;;  %v6834_v51 = vadd.f32 %v3393_v55, %v7834_v45  ;;  %v6706_v23 = vpop.f32.mrb[30].mxu0 }
 0x1ae   : > { %6167 = vst [vmem:[%s8006_s21 + $0x68] sm:$0xff] %v5903_v21   ;;  %v3957_v42 = vadd.f32 %v6833_v39, %v7979_v41  ;;  %v6835_v58 = vadd.f32 %v6706_v23, %v7837_v47  ;;  %v3396_v16 = vpop.f32.mrb[31].mxu0 }
 0x1af   : > { %6166 = vst [vmem:[%s8006_s21 + $0x60] sm:$0xff] %v5898_v2   ;;  %v3955_v9 = vadd.f32 %v6834_v51, %v7979_v41  ;;  %v6836_v14 = vadd.f32 %v3396_v16, %v7841_v50 }
 0x1b0   : > { %v3958_v26 = vadd.f32 %v6835_v58, %v7979_v41  ;;  %v4085_v35 = vmax.f32 %v3957_v42, 0.0 }
 0x1b1   : > { %v3956_v44 = vadd.f32 %v6836_v14, %v7979_v41  ;;  %v4083_v19 = vmax.f32 %v3955_v9, 0.0 }
 0x1b2   : > { %v4086_v45 = vmax.f32 %v3958_v26, 0.0 }
 0x1b3   : > { %v4084_v57 = vmax.f32 %v3956_v44, 0.0  ;;  %v6709_v32 = vpop.f32.mrb[32].mxu0 }
 0x1b4   : > { %v5913_v12 = vpack.c.bf16 %v4086_v45, %v4085_v35  ;;  %v6837_v47 = vadd.f32 %v6709_v32, %v7848_v54  ;;  %v3409_v25 = vpop.f32.mrb[33].mxu0 }
 0x1b5   : > { %v5908_v13 = vpack.c.bf16 %v4084_v57, %v4083_v19  ;;  %v6838_v15 = vadd.f32 %v3409_v25, %v7850_v56  ;;  %v6710_v28 = vpop.f32.mrb[34].mxu0 }
 0x1b6   : > { %6169 = vst [vmem:[%s8006_s21 + $0x78] sm:$0xff] %v5913_v12   ;;  %v3961_v50 = vadd.f32 %v6837_v47, %v7979_v41  ;;  %v6839_v46 = vadd.f32 %v6710_v28, %v7853_v59  ;;  %v3412_v29 = vpop.f32.mrb[35].mxu0 }
 0x1b7   : > { %6168 = vst [vmem:[%s8006_s21 + $0x70] sm:$0xff] %v5908_v13   ;;  %v3959_v30 = vadd.f32 %v6838_v15, %v7979_v41  ;;  %v6840_v62 = vadd.f32 %v3412_v29, %v7857_v1  ;;  %v8363_v15 = vld [vmem:[#allocation5_spill] sm:$0xff] }
 0x1b8   : > { %v3962_v18 = vadd.f32 %v6839_v46, %v7979_v41  ;;  %v4089_v3 = vmax.f32 %v3961_v50, 0.0 }
 0x1b9   : > { %v3960_v54 = vadd.f32 %v6840_v62, %v7979_v41  ;;  %v4087_v31 = vmax.f32 %v3959_v30, 0.0 }
 0x1ba   : > { %v4090_v56 = vmax.f32 %v3962_v18, 0.0 }
 0x1bb   : > { %v4088_v0 = vmax.f32 %v3960_v54, 0.0  ;;  %v6713_v4 = vpop.f32.mrb[36].mxu0  ;;  %v8364_v54 = vld [vmem:[#allocation6_spill] sm:$0xff] }
 0x1bc   : > { %v5923_v5 = vpack.c.bf16 %v4090_v56, %v4089_v3  ;;  %v6841_v59 = vadd.f32 %v6713_v4, %v7864_v6  ;;  %v3425_v48 = vpop.f32.mrb[37].mxu0 }
 0x1bd   : > { %v5918_v34 = vpack.c.bf16 %v4088_v0, %v4087_v31  ;;  %v6842_v7 = vadd.f32 %v3425_v48, %v7866_v8  ;;  %v6714_v60 = vpop.f32.mrb[38].mxu0  ;;  %v8365_v31 = vld [vmem:[#allocation7_spill] sm:$0xff] }
 0x1be   : > { %6171 = vst [vmem:[%s8006_s21 + $0x88] sm:$0xff] %v5923_v5   ;;  %v3965_v1 = vadd.f32 %v6841_v59, %v7979_v41  ;;  %v6843_v52 = vadd.f32 %v6714_v60, %v7869_v11  ;;  %v3428_v10 = vpop.f32.mrb[39].mxu0  ;;  %v8366_v59 = vld [vmem:[#allocation8_spill] sm:$0xff]  ;;  %v8367_v60 = vld [vmem:[#allocation9_spill] sm:$0xff] }
 0x1bf   : > { %6170 = vst [vmem:[%s8006_s21 + $0x80] sm:$0xff] %v5918_v34   ;;  %v3963_v61 = vadd.f32 %v6842_v7, %v7979_v41  ;;  %v6844_v36 = vadd.f32 %v3428_v10, %v7873_v17 }
 0x1c0   : > { %v3966_v53 = vadd.f32 %v6843_v52, %v7979_v41  ;;  %v4093_v37 = vmax.f32 %v3965_v1, 0.0 }
 0x1c1   : > { %v3964_v6 = vadd.f32 %v6844_v36, %v7979_v41  ;;  %v4091_v63 = vmax.f32 %v3963_v61, 0.0 }
 0x1c2   : > { %v4094_v8 = vmax.f32 %v3966_v53, 0.0 }
 0x1c3   : > { %v4092_v49 = vmax.f32 %v3964_v6, 0.0  ;;  %v6717_v20 = vpop.f32.mrb[40].mxu0 }
 0x1c4   : > { %v5933_v21 = vpack.c.bf16 %v4094_v8, %v4093_v37  ;;  %v6845_v11 = vadd.f32 %v6717_v20, %v7880_v22  ;;  %v3441_v39 = vpop.f32.mrb[41].mxu0 }
 0x1c5   : > { %v5928_v55 = vpack.c.bf16 %v4092_v49, %v4091_v63  ;;  %v6846_v2 = vadd.f32 %v3441_v39, %v7882_v24  ;;  %v6718_v51 = vpop.f32.mrb[42].mxu0  ;;  %v8368_v63 = vld [vmem:[#allocation10_spill] sm:$0xff] }
 0x1c6   : > { %6173 = vst [vmem:[%s8006_s21 + $0x98] sm:$0xff] %v5933_v21   ;;  %v3969_v17 = vadd.f32 %v6845_v11, %v7979_v41  ;;  %v6847_v23 = vadd.f32 %v6718_v51, %v7885_v27  ;;  %v3444_v42 = vpop.f32.mrb[43].mxu0  ;;  %v8369_v11 = vld [vmem:[#allocation11_spill] sm:$0xff]  ;;  %v8370_v51 = vld [vmem:[#allocation12_spill] sm:$0xff] }
 0x1c7   : > { %6172 = vst [vmem:[%s8006_s21 + $0x90] sm:$0xff] %v5928_v55   ;;  %v3967_v58 = vadd.f32 %v6846_v2, %v7979_v41  ;;  %v6848_v16 = vadd.f32 %v3444_v42, %v7889_v33 }
 0x1c8   : > { %v3970_v9 = vadd.f32 %v6847_v23, %v7979_v41  ;;  %v4097_v14 = vmax.f32 %v3969_v17, 0.0 }
 0x1c9   : > { %v3968_v22 = vadd.f32 %v6848_v16, %v7979_v41  ;;  %v4095_v26 = vmax.f32 %v3967_v58, 0.0  ;;  %v8371_v58 = vld [vmem:[#allocation13_spill] sm:$0xff] }
 0x1ca   : > { %v4098_v24 = vmax.f32 %v3970_v9, 0.0 }
 0x1cb   : > { %v4096_v44 = vmax.f32 %v3968_v22, 0.0  ;;  %v6721_v35 = vpop.f32.mrb[44].mxu0 }
 0x1cc   : > { %v5943_v45 = vpack.c.bf16 %v4098_v24, %v4097_v14  ;;  %v6849_v27 = vadd.f32 %v6721_v35, %v7896_v38  ;;  %v3457_v19 = vpop.f32.mrb[45].mxu0 }
 0x1cd   : > { %v5938_v57 = vpack.c.bf16 %v4096_v44, %v4095_v26  ;;  %v6850_v32 = vadd.f32 %v3457_v19, %v7898_v40  ;;  %v6722_v12 = vpop.f32.mrb[46].mxu0 }
 0x1ce   : > { %6175 = vst [vmem:[%s8006_s21 + $0xa8] sm:$0xff] %v5943_v45   ;;  %v3973_v33 = vadd.f32 %v6849_v27, %v7979_v41  ;;  %v6851_v47 = vadd.f32 %v6722_v12, %v7901_v43  ;;  %v3460_v25 = vpop.f32.mrb[47].mxu0  ;;  %v8372_v27 = vld [vmem:[#allocation14_spill] sm:$0xff]  ;;  %v8373_v12 = vld [vmem:[#allocation15_spill] sm:$0xff] }
 0x1cf   : > { %6174 = vst [vmem:[%s8006_s21 + $0xa0] sm:$0xff] %v5938_v57   ;;  %v3971_v13 = vadd.f32 %v6850_v32, %v7979_v41  ;;  %v6852_v28 = vadd.f32 %v3460_v25, %v8363_v15 }
 0x1d0   : > { %v3974_v50 = vadd.f32 %v6851_v47, %v7979_v41  ;;  %v4101_v46 = vmax.f32 %v3973_v33, 0.0 }
 0x1d1   : > { %v3972_v38 = vadd.f32 %v6852_v28, %v7979_v41  ;;  %v4099_v29 = vmax.f32 %v3971_v13, 0.0  ;;  %v8374_v13 = vld [vmem:[#allocation16_spill] sm:$0xff] }
 0x1d2   : > { %v4102_v40 = vmax.f32 %v3974_v50, 0.0 }
 0x1d3   : > { %v4100_v30 = vmax.f32 %v3972_v38, 0.0  ;;  %v6725_v62 = vpop.f32.mrb[48].mxu0  ;;  %v8375_v38 = vld [vmem:[#allocation17_spill] sm:$0xff] }
 0x1d4   : > { %v5953_v18 = vpack.c.bf16 %v4102_v40, %v4101_v46  ;;  %v6853_v43 = vadd.f32 %v6725_v62, %v8364_v54  ;;  %v3473_v3 = vpop.f32.mrb[49].mxu0 }
 0x1d5   : > { %v5948_v56 = vpack.c.bf16 %v4100_v30, %v4099_v29  ;;  %v6854_v0 = vadd.f32 %v3473_v3, %v8365_v31  ;;  %v6726_v4 = vpop.f32.mrb[50].mxu0 }
 0x1d6   : > { %6177 = vst [vmem:[%s8006_s21 + $0xb8] sm:$0xff] %v5953_v18   ;;  %v3977_v5 = vadd.f32 %v6853_v43, %v7979_v41  ;;  %v6855_v48 = vadd.f32 %v6726_v4, %v8366_v59  ;;  %v3476_v34 = vpop.f32.mrb[51].mxu0 }
 0x1d7   : > { %6176 = vst [vmem:[%s8006_s21 + $0xb0] sm:$0xff] %v5948_v56   ;;  %v3975_v7 = vadd.f32 %v6854_v0, %v7979_v41  ;;  %v6856_v1 = vadd.f32 %v3476_v34, %v8367_v60  ;;  %v8376_v56 = vld [vmem:[#allocation18_spill] sm:$0xff] }
 0x1d8   : > { %v3978_v52 = vadd.f32 %v6855_v48, %v7979_v41  ;;  %v4105_v61 = vmax.f32 %v3977_v5, 0.0  ;;  %v8377_v5 = vld [vmem:[#allocation19_spill] sm:$0xff] }
 0x1d9   : > { %v3976_v10 = vadd.f32 %v6856_v1, %v7979_v41  ;;  %v4103_v53 = vmax.f32 %v3975_v7, 0.0  ;;  %v8378_v7 = vld [vmem:[#allocation20_spill] sm:$0xff] }
 0x1da   : > { %v4106_v36 = vmax.f32 %v3978_v52, 0.0 }
 0x1db   : > { %v4104_v6 = vmax.f32 %v3976_v10, 0.0  ;;  %v6729_v37 = vpop.f32.mrb[52].mxu0  ;;  %v8379_v10 = vld [vmem:[#allocation21_spill] sm:$0xff] }
 0x1dc   : > { %v5963_v8 = vpack.c.bf16 %v4106_v36, %v4105_v61  ;;  %v6857_v49 = vadd.f32 %v6729_v37, %v8368_v63  ;;  %v3489_v20 = vpop.f32.mrb[53].mxu0 }
 0x1dd   : > { %v5958_v21 = vpack.c.bf16 %v4104_v6, %v4103_v53  ;;  %v6858_v39 = vadd.f32 %v3489_v20, %v8369_v11  ;;  %v6730_v55 = vpop.f32.mrb[54].mxu0 }
 0x1de   : > { %6179 = vst [vmem:[%s8006_s21 + $0xc8] sm:$0xff] %v5963_v8   ;;  %v3981_v2 = vadd.f32 %v6857_v49, %v7979_v41  ;;  %v6859_v17 = vadd.f32 %v6730_v55, %v8370_v51  ;;  %v3492_v23 = vpop.f32.mrb[55].mxu0 }
 0x1df   : > { %6178 = vst [vmem:[%s8006_s21 + $0xc0] sm:$0xff] %v5958_v21   ;;  %v3979_v42 = vadd.f32 %v6858_v39, %v7979_v41  ;;  %v6860_v16 = vadd.f32 %v3492_v23, %v8371_v58 }
 0x1e0   : > { %v3982_v9 = vadd.f32 %v6859_v17, %v7979_v41  ;;  %v4109_v14 = vmax.f32 %v3981_v2, 0.0 }
 0x1e1   : > { %v3980_v22 = vadd.f32 %v6860_v16, %v7979_v41  ;;  %v4107_v26 = vmax.f32 %v3979_v42, 0.0 }
 0x1e2   : > { %v4110_v24 = vmax.f32 %v3982_v9, 0.0 }
 0x1e3   : > { %v4108_v44 = vmax.f32 %v3980_v22, 0.0  ;;  %v6733_v35 = vpop.f32.mrb[56].mxu0 }
 0x1e4   : > { %v5973_v45 = vpack.c.bf16 %v4110_v24, %v4109_v14  ;;  %v6861_v19 = vadd.f32 %v6733_v35, %v8372_v27  ;;  %v3505_v57 = vpop.f32.mrb[57].mxu0 }
 0x1e5   : > { %v5968_v32 = vpack.c.bf16 %v4108_v44, %v4107_v26  ;;  %v6862_v33 = vadd.f32 %v3505_v57, %v8373_v12  ;;  %v6734_v47 = vpop.f32.mrb[58].mxu0 }
 0x1e6   : > { %6181 = vst [vmem:[%s8006_s21 + $0xd8] sm:$0xff] %v5973_v45   ;;  %v3985_v25 = vadd.f32 %v6861_v19, %v7979_v41  ;;  %v6863_v15 = vadd.f32 %v6734_v47, %v8374_v13  ;;  %v3508_v28 = vpop.f32.mrb[59].mxu0 }
 0x1e7   : > { %6180 = vst [vmem:[%s8006_s21 + $0xd0] sm:$0xff] %v5968_v32   ;;  %v3983_v50 = vadd.f32 %v6862_v33, %v7979_v41  ;;  %v6864_v46 = vadd.f32 %v3508_v28, %v8375_v38 }
 0x1e8   : > { %v3986_v40 = vadd.f32 %v6863_v15, %v7979_v41  ;;  %v4113_v30 = vmax.f32 %v3985_v25, 0.0 }
 0x1e9   : > { %v3984_v29 = vadd.f32 %v6864_v46, %v7979_v41  ;;  %v4111_v18 = vmax.f32 %v3983_v50, 0.0 }
 0x1ea   : > { %v4114_v62 = vmax.f32 %v3986_v40, 0.0 }
 0x1eb   : > { %v4112_v54 = vmax.f32 %v3984_v29, 0.0  ;;  %v6737_v43 = vpop.f32.mrb[60].mxu0 }
 0x1ec   : > { %v5983_v3 = vpack.c.bf16 %v4114_v62, %v4113_v30  ;;  %v6865_v31 = vadd.f32 %v6737_v43, %v8376_v56  ;;  %v3521_v0 = vpop.f32.mrb[61].mxu0 }
 0x1ed   : > { %v5978_v4 = vpack.c.bf16 %v4112_v54, %v4111_v18  ;;  %v6866_v59 = vadd.f32 %v3521_v0, %v8377_v5  ;;  %v6738_v48 = vpop.f32.mrb[62].mxu0 }
 0x1ee   : > { %6183 = vst [vmem:[%s8006_s21 + $0xe8] sm:$0xff] %v5983_v3   ;;  %v3989_v34 = vadd.f32 %v6865_v31, %v7979_v41  ;;  %v6867_v60 = vadd.f32 %v6738_v48, %v8378_v7  ;;  %v3524_v1 = vpop.f32.mrb[63].mxu0 }
 0x1ef   : > { %6182 = vst [vmem:[%s8006_s21 + $0xe0] sm:$0xff] %v5978_v4   ;;  %v3987_v52 = vadd.f32 %v6866_v59, %v7979_v41  ;;  %v6868_v61 = vadd.f32 %v3524_v1, %v8379_v10 }
 0x1f0   : > { %v3990_v36 = vadd.f32 %v6867_v60, %v7979_v41  ;;  %v4117_v6 = vmax.f32 %v3989_v34, 0.0 }
 0x1f1   : > { %v3988_v53 = vadd.f32 %v6868_v61, %v7979_v41  ;;  %v4115_v63 = vmax.f32 %v3987_v52, 0.0 }
 0x1f2   : > { %v4118_v37 = vmax.f32 %v3990_v36, 0.0  ;;  %v6611_v8 = vpop.f32.mrb[64].mxu1 }
 0x1f3   : > { %v4116_v49 = vmax.f32 %v3988_v53, 0.0  ;;  %v6741_v20 = vpop.f32.mrb[64].mxu0  ;;  %v2340_v21 = vpop.f32.mrb[65].mxu1 }
 0x1f4   : > { %v5993_v11 = vpack.c.bf16 %v4118_v37, %v4117_v6  ;;  %v6869_v39 = vadd.f32 %v6741_v20, %v6611_v8  ;;  %v3537_v55 = vpop.f32.mrb[65].mxu0  ;;  %v6612_v2 = vpop.f32.mrb[66].mxu1 }
 0x1f5   : > { %v5988_v51 = vpack.c.bf16 %v4116_v49, %v4115_v63  ;;  %v6870_v17 = vadd.f32 %v3537_v55, %v2340_v21  ;;  %v6742_v23 = vpop.f32.mrb[66].mxu0  ;;  %v2343_v42 = vpop.f32.mrb[67].mxu1 }
 0x1f6   : > { %6185 = vst [vmem:[%s8006_s21 + $0xf8] sm:$0xff] %v5993_v11   ;;  %v3993_v58 = vadd.f32 %v6869_v39, %v7979_v41  ;;  %v6871_v16 = vadd.f32 %v6742_v23, %v6612_v2  ;;  %v3540_v9 = vpop.f32.mrb[67].mxu0 }
 0x1f7   : > { %6184 = vst [vmem:[%s8006_s21 + $0xf0] sm:$0xff] %v5988_v51   ;;  %v3991_v22 = vadd.f32 %v6870_v17, %v7979_v41  ;;  %v6872_v14 = vadd.f32 %v3540_v9, %v2343_v42 }
 0x1f8   : > { %v3994_v24 = vadd.f32 %v6871_v16, %v7979_v41  ;;  %v4121_v44 = vmax.f32 %v3993_v58, 0.0 }
 0x1f9   : > { %v3992_v26 = vadd.f32 %v6872_v14, %v7979_v41  ;;  %v4119_v27 = vmax.f32 %v3991_v22, 0.0 }
 0x1fa   : > { %v4122_v35 = vmax.f32 %v3994_v24, 0.0  ;;  %v6615_v45 = vpop.f32.mrb[68].mxu1 }
 0x1fb   : > { %v4120_v19 = vmax.f32 %v3992_v26, 0.0  ;;  %v6745_v57 = vpop.f32.mrb[68].mxu0  ;;  %v2356_v32 = vpop.f32.mrb[69].mxu1 }
 0x1fc   : > { %v6003_v12 = vpack.c.bf16 %v4122_v35, %v4121_v44  ;;  %v6873_v33 = vadd.f32 %v6745_v57, %v6615_v45  ;;  %v3553_v47 = vpop.f32.mrb[69].mxu0  ;;  %v6616_v25 = vpop.f32.mrb[70].mxu1 }
 0x1fd   : > { %v5998_v13 = vpack.c.bf16 %v4120_v19, %v4119_v27  ;;  %v6874_v15 = vadd.f32 %v3553_v47, %v2356_v32  ;;  %v6746_v28 = vpop.f32.mrb[70].mxu0  ;;  %v2359_v50 = vpop.f32.mrb[71].mxu1 }
 0x1fe   : > { %6187 = vst [vmem:[%s8006_s21 + $0x108] sm:$0xff] %v6003_v12   ;;  %v3997_v38 = vadd.f32 %v6873_v33, %v7979_v41  ;;  %v6875_v46 = vadd.f32 %v6746_v28, %v6616_v25  ;;  %v3556_v40 = vpop.f32.mrb[71].mxu0 }
 0x1ff   : > { %6186 = vst [vmem:[%s8006_s21 + $0x100] sm:$0xff] %v5998_v13   ;;  %v3995_v29 = vadd.f32 %v6874_v15, %v7979_v41  ;;  %v6876_v30 = vadd.f32 %v3556_v40, %v2359_v50 }
 0x200   : > { %v3998_v62 = vadd.f32 %v6875_v46, %v7979_v41  ;;  %v4125_v54 = vmax.f32 %v3997_v38, 0.0 }
 0x201   : > { %v3996_v18 = vadd.f32 %v6876_v30, %v7979_v41  ;;  %v4123_v56 = vmax.f32 %v3995_v29, 0.0 }
 0x202   : > { %v4126_v43 = vmax.f32 %v3998_v62, 0.0  ;;  %v6619_v3 = vpop.f32.mrb[72].mxu1 }
 0x203   : > { %v4124_v31 = vmax.f32 %v3996_v18, 0.0  ;;  %v6749_v0 = vpop.f32.mrb[72].mxu0  ;;  %v2372_v4 = vpop.f32.mrb[73].mxu1 }
 0x204   : > { %v6013_v5 = vpack.c.bf16 %v4126_v43, %v4125_v54  ;;  %v6877_v59 = vadd.f32 %v6749_v0, %v6619_v3  ;;  %v3569_v48 = vpop.f32.mrb[73].mxu0  ;;  %v6620_v34 = vpop.f32.mrb[74].mxu1 }
 0x205   : > { %v6008_v7 = vpack.c.bf16 %v4124_v31, %v4123_v56  ;;  %v6878_v60 = vadd.f32 %v3569_v48, %v2372_v4  ;;  %v6750_v1 = vpop.f32.mrb[74].mxu0  ;;  %v2375_v52 = vpop.f32.mrb[75].mxu1 }
 0x206   : > { %6189 = vst [vmem:[%s8006_s21 + $0x118] sm:$0xff] %v6013_v5   ;;  %v4001_v10 = vadd.f32 %v6877_v59, %v7979_v41  ;;  %v6879_v61 = vadd.f32 %v6750_v1, %v6620_v34  ;;  %v3572_v36 = vpop.f32.mrb[75].mxu0 }
 0x207   : > { %6188 = vst [vmem:[%s8006_s21 + $0x110] sm:$0xff] %v6008_v7   ;;  %v3999_v53 = vadd.f32 %v6878_v60, %v7979_v41  ;;  %v6880_v6 = vadd.f32 %v3572_v36, %v2375_v52 }
 0x208   : > { %v4002_v37 = vadd.f32 %v6879_v61, %v7979_v41  ;;  %v4129_v63 = vmax.f32 %v4001_v10, 0.0 }
 0x209   : > { %v4000_v8 = vadd.f32 %v6880_v6, %v7979_v41  ;;  %v4127_v21 = vmax.f32 %v3999_v53, 0.0 }
 0x20a   : > { %v4130_v49 = vmax.f32 %v4002_v37, 0.0  ;;  %v6623_v20 = vpop.f32.mrb[76].mxu1 }
 0x20b   : > { %v4128_v11 = vmax.f32 %v4000_v8, 0.0  ;;  %v6753_v39 = vpop.f32.mrb[76].mxu0  ;;  %v2388_v55 = vpop.f32.mrb[77].mxu1 }
 0x20c   : > { %v6023_v2 = vpack.c.bf16 %v4130_v49, %v4129_v63  ;;  %v6881_v51 = vadd.f32 %v6753_v39, %v6623_v20  ;;  %v3585_v17 = vpop.f32.mrb[77].mxu0  ;;  %v6624_v23 = vpop.f32.mrb[78].mxu1 }
 0x20d   : > { %v6018_v42 = vpack.c.bf16 %v4128_v11, %v4127_v21  ;;  %v6882_v58 = vadd.f32 %v3585_v17, %v2388_v55  ;;  %v6754_v16 = vpop.f32.mrb[78].mxu0  ;;  %v2391_v9 = vpop.f32.mrb[79].mxu1 }
 0x20e   : > { %6191 = vst [vmem:[%s8006_s21 + $0x128] sm:$0xff] %v6023_v2   ;;  %v4005_v22 = vadd.f32 %v6881_v51, %v7979_v41  ;;  %v6883_v14 = vadd.f32 %v6754_v16, %v6624_v23  ;;  %v3588_v24 = vpop.f32.mrb[79].mxu0 }
 0x20f   : > { %6190 = vst [vmem:[%s8006_s21 + $0x120] sm:$0xff] %v6018_v42   ;;  %v4003_v26 = vadd.f32 %v6882_v58, %v7979_v41  ;;  %v6884_v44 = vadd.f32 %v3588_v24, %v2391_v9 }
 0x210   : > { %v4006_v35 = vadd.f32 %v6883_v14, %v7979_v41  ;;  %v4133_v27 = vmax.f32 %v4005_v22, 0.0 }
 0x211   : > { %v4004_v45 = vadd.f32 %v6884_v44, %v7979_v41  ;;  %v4131_v32 = vmax.f32 %v4003_v26, 0.0 }
 0x212   : > { %v4134_v19 = vmax.f32 %v4006_v35, 0.0  ;;  %v6627_v57 = vpop.f32.mrb[80].mxu1 }
 0x213   : > { %v4132_v12 = vmax.f32 %v4004_v45, 0.0  ;;  %v6757_v33 = vpop.f32.mrb[80].mxu0  ;;  %v2404_v47 = vpop.f32.mrb[81].mxu1  ;;  %v8222_v45 = vld [vmem:[%s8342_s2] ss:$0 sm:$0xff] }
 0x214   : > { %v6033_v25 = vpack.c.bf16 %v4134_v19, %v4133_v27  ;;  %v6885_v13 = vadd.f32 %v6757_v33, %v6627_v57  ;;  %v3601_v15 = vpop.f32.mrb[81].mxu0  ;;  %v6628_v28 = vpop.f32.mrb[82].mxu1 }
 0x215   : > { %v6028_v50 = vpack.c.bf16 %v4132_v12, %v4131_v32  ;;  %v6886_v38 = vadd.f32 %v3601_v15, %v2404_v47  ;;  %v6758_v46 = vpop.f32.mrb[82].mxu0  ;;  %v2407_v40 = vpop.f32.mrb[83].mxu1 }
 0x216   : > { %6193 = vst [vmem:[%s8006_s21 + $0x138] sm:$0xff] %v6033_v25   ;;  %v4009_v29 = vadd.f32 %v6885_v13, %v7979_v41  ;;  %v6887_v30 = vadd.f32 %v6758_v46, %v6628_v28  ;;  %v3604_v62 = vpop.f32.mrb[83].mxu0 }
 0x217   : > { %6192 = vst [vmem:[%s8006_s21 + $0x130] sm:$0xff] %v6028_v50   ;;  %v4007_v18 = vadd.f32 %v6886_v38, %v7979_v41  ;;  %v6888_v54 = vadd.f32 %v3604_v62, %v2407_v40 }
 0x218   : > { %v4010_v43 = vadd.f32 %v6887_v30, %v7979_v41  ;;  %v4137_v56 = vmax.f32 %v4009_v29, 0.0 }
 0x219   : > { %v4008_v3 = vadd.f32 %v6888_v54, %v7979_v41  ;;  %v4135_v4 = vmax.f32 %v4007_v18, 0.0 }
 0x21a   : > { %v4138_v31 = vmax.f32 %v4010_v43, 0.0  ;;  %v6631_v0 = vpop.f32.mrb[84].mxu1 }
 0x21b   : > { %v4136_v5 = vmax.f32 %v4008_v3, 0.0  ;;  %v6761_v59 = vpop.f32.mrb[84].mxu0  ;;  %v2420_v48 = vpop.f32.mrb[85].mxu1 }
 0x21c   : > { %v6043_v34 = vpack.c.bf16 %v4138_v31, %v4137_v56  ;;  %v6889_v7 = vadd.f32 %v6761_v59, %v6631_v0  ;;  %v3617_v60 = vpop.f32.mrb[85].mxu0  ;;  %v6632_v1 = vpop.f32.mrb[86].mxu1 }
 0x21d   : > { %v6038_v52 = vpack.c.bf16 %v4136_v5, %v4135_v4  ;;  %v6890_v10 = vadd.f32 %v3617_v60, %v2420_v48  ;;  %v6762_v61 = vpop.f32.mrb[86].mxu0  ;;  %v2423_v36 = vpop.f32.mrb[87].mxu1 }
 0x21e   : > { %6195 = vst [vmem:[%s8006_s21 + $0x148] sm:$0xff] %v6043_v34   ;;  %v4013_v53 = vadd.f32 %v6889_v7, %v7979_v41  ;;  %v6891_v6 = vadd.f32 %v6762_v61, %v6632_v1  ;;  %v3620_v37 = vpop.f32.mrb[87].mxu0 }
 0x21f   : > { %6194 = vst [vmem:[%s8006_s21 + $0x140] sm:$0xff] %v6038_v52   ;;  %v4011_v8 = vadd.f32 %v6890_v10, %v7979_v41  ;;  %v6892_v63 = vadd.f32 %v3620_v37, %v2423_v36 }
 0x220   : > { %v4014_v49 = vadd.f32 %v6891_v6, %v7979_v41  ;;  %v4141_v21 = vmax.f32 %v4013_v53, 0.0 }
 0x221   : > { %v4012_v20 = vadd.f32 %v6892_v63, %v7979_v41  ;;  %v4139_v55 = vmax.f32 %v4011_v8, 0.0 }
 0x222   : > { %v4142_v11 = vmax.f32 %v4014_v49, 0.0  ;;  %v6635_v39 = vpop.f32.mrb[88].mxu1 }
 0x223   : > { %v4140_v2 = vmax.f32 %v4012_v20, 0.0  ;;  %v6765_v51 = vpop.f32.mrb[88].mxu0  ;;  %v2436_v17 = vpop.f32.mrb[89].mxu1 }
 0x224   : > { %v6053_v23 = vpack.c.bf16 %v4142_v11, %v4141_v21  ;;  %v6893_v42 = vadd.f32 %v6765_v51, %v6635_v39  ;;  %v3633_v58 = vpop.f32.mrb[89].mxu0  ;;  %v6636_v16 = vpop.f32.mrb[90].mxu1 }
 0x225   : > { %v6048_v9 = vpack.c.bf16 %v4140_v2, %v4139_v55  ;;  %v6894_v22 = vadd.f32 %v3633_v58, %v2436_v17  ;;  %v6766_v14 = vpop.f32.mrb[90].mxu0  ;;  %v2439_v24 = vpop.f32.mrb[91].mxu1 }
 0x226   : > { %6197 = vst [vmem:[%s8006_s21 + $0x158] sm:$0xff] %v6053_v23   ;;  %v4017_v26 = vadd.f32 %v6893_v42, %v7979_v41  ;;  %v6895_v44 = vadd.f32 %v6766_v14, %v6636_v16  ;;  %v3636_v35 = vpop.f32.mrb[91].mxu0 }
 0x227   : > { %6196 = vst [vmem:[%s8006_s21 + $0x150] sm:$0xff] %v6048_v9   ;;  %v4015_v27 = vadd.f32 %v8222_v45, %v6894_v22  ;;  %v6896_v19 = vadd.f32 %v3636_v35, %v2439_v24 }
 0x228   : > { %v4018_v57 = vadd.f32 %v8222_v45, %v6895_v44  ;;  %v4145_v12 = vmax.f32 %v4017_v26, 0.0 }
 0x229   : > { %v4016_v32 = vadd.f32 %v8222_v45, %v6896_v19  ;;  %v4143_v41 = vmax.f32 %v4015_v27, 0.0 }
 0x22a   : > { %v4146_v33 = vmax.f32 %v4018_v57, 0.0  ;;  %v6639_v47 = vpop.f32.mrb[92].mxu1 }
 0x22b   : > { %v4144_v25 = vmax.f32 %v4016_v32, 0.0  ;;  %v6769_v13 = vpop.f32.mrb[92].mxu0  ;;  %v2452_v15 = vpop.f32.mrb[93].mxu1 }
 0x22c   : > { %v6063_v28 = vpack.c.bf16 %v4146_v33, %v4145_v12  ;;  %v6897_v50 = vadd.f32 %v6769_v13, %v6639_v47  ;;  %v3649_v38 = vpop.f32.mrb[93].mxu0  ;;  %v6640_v46 = vpop.f32.mrb[94].mxu1 }
 0x22d   : > { %v6058_v40 = vpack.c.bf16 %v4144_v25, %v4143_v41  ;;  %v6898_v29 = vadd.f32 %v3649_v38, %v2452_v15  ;;  %v6770_v30 = vpop.f32.mrb[94].mxu0  ;;  %v2455_v62 = vpop.f32.mrb[95].mxu1 }
 0x22e   : > { %6199 = vst [vmem:[%s8006_s21 + $0x168] sm:$0xff] %v6063_v28   ;;  %v4021_v18 = vadd.f32 %v8222_v45, %v6897_v50  ;;  %v6899_v54 = vadd.f32 %v6770_v30, %v6640_v46  ;;  %v3652_v43 = vpop.f32.mrb[95].mxu0 }
 0x22f   : > { %6198 = vst [vmem:[%s8006_s21 + $0x160] sm:$0xff] %v6058_v40   ;;  %v4019_v3 = vadd.f32 %v8222_v45, %v6898_v29  ;;  %v6900_v56 = vadd.f32 %v3652_v43, %v2455_v62 }
 0x230   : > { %v4022_v31 = vadd.f32 %v8222_v45, %v6899_v54  ;;  %v4149_v4 = vmax.f32 %v4021_v18, 0.0 }
 0x231   : > { %v4020_v0 = vadd.f32 %v8222_v45, %v6900_v56  ;;  %v4147_v48 = vmax.f32 %v4019_v3, 0.0 }
 0x232   : > { %v4150_v5 = vmax.f32 %v4022_v31, 0.0  ;;  %v6643_v59 = vpop.f32.mrb[96].mxu1 }
 0x233   : > { %v4148_v34 = vmax.f32 %v4020_v0, 0.0  ;;  %v6773_v7 = vpop.f32.mrb[96].mxu0  ;;  %v2468_v60 = vpop.f32.mrb[97].mxu1 }
 0x234   : > { %v6073_v1 = vpack.c.bf16 %v4150_v5, %v4149_v4  ;;  %v6901_v52 = vadd.f32 %v6773_v7, %v6643_v59  ;;  %v3665_v10 = vpop.f32.mrb[97].mxu0  ;;  %v6644_v61 = vpop.f32.mrb[98].mxu1 }
 0x235   : > { %v6068_v36 = vpack.c.bf16 %v4148_v34, %v4147_v48  ;;  %v6902_v53 = vadd.f32 %v3665_v10, %v2468_v60  ;;  %v6774_v6 = vpop.f32.mrb[98].mxu0  ;;  %v2471_v37 = vpop.f32.mrb[99].mxu1 }
 0x236   : > { %6201 = vst [vmem:[%s8006_s21 + $0x178] sm:$0xff] %v6073_v1   ;;  %v4025_v8 = vadd.f32 %v8222_v45, %v6901_v52  ;;  %v6903_v63 = vadd.f32 %v6774_v6, %v6644_v61  ;;  %v3668_v49 = vpop.f32.mrb[99].mxu0 }
 0x237   : > { %6200 = vst [vmem:[%s8006_s21 + $0x170] sm:$0xff] %v6068_v36   ;;  %v4023_v20 = vadd.f32 %v8222_v45, %v6902_v53  ;;  %v6904_v21 = vadd.f32 %v3668_v49, %v2471_v37 }
 0x238   : > { %v4026_v11 = vadd.f32 %v8222_v45, %v6903_v63  ;;  %v4153_v55 = vmax.f32 %v4025_v8, 0.0 }
 0x239   : > { %v4024_v39 = vadd.f32 %v8222_v45, %v6904_v21  ;;  %v4151_v17 = vmax.f32 %v4023_v20, 0.0 }
 0x23a   : > { %v4154_v2 = vmax.f32 %v4026_v11, 0.0  ;;  %v6647_v51 = vpop.f32.mrb[100].mxu1 }
 0x23b   : > { %v4152_v23 = vmax.f32 %v4024_v39, 0.0  ;;  %v6777_v42 = vpop.f32.mrb[100].mxu0  ;;  %v2484_v58 = vpop.f32.mrb[101].mxu1 }
 0x23c   : > { %v6083_v16 = vpack.c.bf16 %v4154_v2, %v4153_v55  ;;  %v6905_v9 = vadd.f32 %v6777_v42, %v6647_v51  ;;  %v3681_v22 = vpop.f32.mrb[101].mxu0  ;;  %v6648_v14 = vpop.f32.mrb[102].mxu1 }
 0x23d   : > { %v6078_v24 = vpack.c.bf16 %v4152_v23, %v4151_v17  ;;  %v6906_v26 = vadd.f32 %v3681_v22, %v2484_v58  ;;  %v6778_v44 = vpop.f32.mrb[102].mxu0  ;;  %v2487_v35 = vpop.f32.mrb[103].mxu1 }
 0x23e   : > { %6203 = vst [vmem:[%s8006_s21 + $0x188] sm:$0xff] %v6083_v16   ;;  %v4029_v27 = vadd.f32 %v8222_v45, %v6905_v9  ;;  %v6907_v19 = vadd.f32 %v6778_v44, %v6648_v14  ;;  %v3684_v57 = vpop.f32.mrb[103].mxu0 }
 0x23f   : > { %6202 = vst [vmem:[%s8006_s21 + $0x180] sm:$0xff] %v6078_v24   ;;  %v4027_v32 = vadd.f32 %v8222_v45, %v6906_v26  ;;  %v6908_v12 = vadd.f32 %v3684_v57, %v2487_v35 }
 0x240   : > { %v4030_v33 = vadd.f32 %v8222_v45, %v6907_v19  ;;  %v4157_v41 = vmax.f32 %v4029_v27, 0.0 }
 0x241   : > { %v4028_v47 = vadd.f32 %v8222_v45, %v6908_v12  ;;  %v4155_v15 = vmax.f32 %v4027_v32, 0.0 }
 0x242   : > { %v4158_v25 = vmax.f32 %v4030_v33, 0.0  ;;  %v6651_v13 = vpop.f32.mrb[104].mxu1 }
 0x243   : > { %v4156_v28 = vmax.f32 %v4028_v47, 0.0  ;;  %v6781_v50 = vpop.f32.mrb[104].mxu0  ;;  %v2500_v38 = vpop.f32.mrb[105].mxu1 }
 0x244   : > { %v6093_v46 = vpack.c.bf16 %v4158_v25, %v4157_v41  ;;  %v6909_v40 = vadd.f32 %v6781_v50, %v6651_v13  ;;  %v3697_v29 = vpop.f32.mrb[105].mxu0  ;;  %v6652_v30 = vpop.f32.mrb[106].mxu1 }
 0x245   : > { %v6088_v62 = vpack.c.bf16 %v4156_v28, %v4155_v15  ;;  %v6910_v18 = vadd.f32 %v3697_v29, %v2500_v38  ;;  %v6782_v54 = vpop.f32.mrb[106].mxu0  ;;  %v2503_v43 = vpop.f32.mrb[107].mxu1 }
 0x246   : > { %6205 = vst [vmem:[%s8006_s21 + $0x198] sm:$0xff] %v6093_v46   ;;  %v4033_v3 = vadd.f32 %v8222_v45, %v6909_v40  ;;  %v6911_v56 = vadd.f32 %v6782_v54, %v6652_v30  ;;  %v3700_v31 = vpop.f32.mrb[107].mxu0 }
 0x247   : > { %6204 = vst [vmem:[%s8006_s21 + $0x190] sm:$0xff] %v6088_v62   ;;  %v4031_v0 = vadd.f32 %v8222_v45, %v6910_v18  ;;  %v6912_v4 = vadd.f32 %v3700_v31, %v2503_v43 }
 0x248   : > { %v4034_v5 = vadd.f32 %v8222_v45, %v6911_v56  ;;  %v4161_v48 = vmax.f32 %v4033_v3, 0.0 }
 0x249   : > { %v4032_v59 = vadd.f32 %v8222_v45, %v6912_v4  ;;  %v4159_v60 = vmax.f32 %v4031_v0, 0.0 }
 0x24a   : > { %v4162_v34 = vmax.f32 %v4034_v5, 0.0  ;;  %v6655_v7 = vpop.f32.mrb[108].mxu1 }
 0x24b   : > { %v4160_v1 = vmax.f32 %v4032_v59, 0.0  ;;  %v6785_v52 = vpop.f32.mrb[108].mxu0  ;;  %v2516_v10 = vpop.f32.mrb[109].mxu1 }
 0x24c   : > { %v6103_v61 = vpack.c.bf16 %v4162_v34, %v4161_v48  ;;  %v6913_v36 = vadd.f32 %v6785_v52, %v6655_v7  ;;  %v3713_v53 = vpop.f32.mrb[109].mxu0  ;;  %v6656_v6 = vpop.f32.mrb[110].mxu1 }
 0x24d   : > { %v6098_v37 = vpack.c.bf16 %v4160_v1, %v4159_v60  ;;  %v6914_v8 = vadd.f32 %v3713_v53, %v2516_v10  ;;  %v6786_v63 = vpop.f32.mrb[110].mxu0  ;;  %v2519_v49 = vpop.f32.mrb[111].mxu1 }
 0x24e   : > { %6207 = vst [vmem:[%s8006_s21 + $0x1a8] sm:$0xff] %v6103_v61   ;;  %v4037_v20 = vadd.f32 %v8222_v45, %v6913_v36  ;;  %v6915_v21 = vadd.f32 %v6786_v63, %v6656_v6  ;;  %v3716_v11 = vpop.f32.mrb[111].mxu0 }
 0x24f   : > { %6206 = vst [vmem:[%s8006_s21 + $0x1a0] sm:$0xff] %v6098_v37   ;;  %v4035_v39 = vadd.f32 %v8222_v45, %v6914_v8  ;;  %v6916_v55 = vadd.f32 %v3716_v11, %v2519_v49 }
 0x250   : > { %v4038_v2 = vadd.f32 %v8222_v45, %v6915_v21  ;;  %v4165_v17 = vmax.f32 %v4037_v20, 0.0 }
 0x251   : > { %v4036_v51 = vadd.f32 %v8222_v45, %v6916_v55  ;;  %v4163_v58 = vmax.f32 %v4035_v39, 0.0 }
 0x252   : > { %v4166_v23 = vmax.f32 %v4038_v2, 0.0  ;;  %v6659_v42 = vpop.f32.mrb[112].mxu1 }
 0x253   : > { %v4164_v16 = vmax.f32 %v4036_v51, 0.0  ;;  %v6789_v9 = vpop.f32.mrb[112].mxu0  ;;  %v2532_v22 = vpop.f32.mrb[113].mxu1 }
 0x254   : > { %v6113_v14 = vpack.c.bf16 %v4166_v23, %v4165_v17  ;;  %v6917_v24 = vadd.f32 %v6789_v9, %v6659_v42  ;;  %v3729_v26 = vpop.f32.mrb[113].mxu0  ;;  %v6660_v44 = vpop.f32.mrb[114].mxu1 }
 0x255   : > { %v6108_v35 = vpack.c.bf16 %v4164_v16, %v4163_v58  ;;  %v6918_v27 = vadd.f32 %v3729_v26, %v2532_v22  ;;  %v6790_v19 = vpop.f32.mrb[114].mxu0  ;;  %v2535_v57 = vpop.f32.mrb[115].mxu1 }
 0x256   : > { %6209 = vst [vmem:[%s8006_s21 + $0x1b8] sm:$0xff] %v6113_v14   ;;  %v4041_v32 = vadd.f32 %v8222_v45, %v6917_v24  ;;  %v6919_v12 = vadd.f32 %v6790_v19, %v6660_v44  ;;  %v3732_v33 = vpop.f32.mrb[115].mxu0 }
 0x257   : > { %6208 = vst [vmem:[%s8006_s21 + $0x1b0] sm:$0xff] %v6108_v35   ;;  %v4039_v47 = vadd.f32 %v8222_v45, %v6918_v27  ;;  %v6920_v41 = vadd.f32 %v3732_v33, %v2535_v57 }
 0x258   : > { %v4042_v25 = vadd.f32 %v8222_v45, %v6919_v12  ;;  %v4169_v15 = vmax.f32 %v4041_v32, 0.0 }
 0x259   : > { %v4040_v13 = vadd.f32 %v8222_v45, %v6920_v41  ;;  %v4167_v38 = vmax.f32 %v4039_v47, 0.0 }
 0x25a   : > { %v4170_v28 = vmax.f32 %v4042_v25, 0.0  ;;  %v6663_v50 = vpop.f32.mrb[116].mxu1 }
 0x25b   : > { %v4168_v46 = vmax.f32 %v4040_v13, 0.0  ;;  %v6793_v40 = vpop.f32.mrb[116].mxu0  ;;  %v2548_v29 = vpop.f32.mrb[117].mxu1 }
 0x25c   : > { %v6123_v30 = vpack.c.bf16 %v4170_v28, %v4169_v15  ;;  %v6921_v62 = vadd.f32 %v6793_v40, %v6663_v50  ;;  %v3745_v18 = vpop.f32.mrb[117].mxu0  ;;  %v6664_v54 = vpop.f32.mrb[118].mxu1 }
 0x25d   : > { %v6118_v43 = vpack.c.bf16 %v4168_v46, %v4167_v38  ;;  %v6922_v3 = vadd.f32 %v3745_v18, %v2548_v29  ;;  %v6794_v56 = vpop.f32.mrb[118].mxu0  ;;  %v2551_v31 = vpop.f32.mrb[119].mxu1 }
 0x25e   : > { %6211 = vst [vmem:[%s8006_s21 + $0x1c8] sm:$0xff] %v6123_v30   ;;  %v4045_v0 = vadd.f32 %v8222_v45, %v6921_v62  ;;  %v6923_v4 = vadd.f32 %v6794_v56, %v6664_v54  ;;  %v3748_v5 = vpop.f32.mrb[119].mxu0 }
 0x25f   : > { %6210 = vst [vmem:[%s8006_s21 + $0x1c0] sm:$0xff] %v6118_v43   ;;  %v4043_v59 = vadd.f32 %v8222_v45, %v6922_v3  ;;  %v6924_v48 = vadd.f32 %v3748_v5, %v2551_v31 }
 0x260   : > { %v4046_v34 = vadd.f32 %v8222_v45, %v6923_v4  ;;  %v4173_v60 = vmax.f32 %v4045_v0, 0.0 }
 0x261   : > { %v4044_v7 = vadd.f32 %v8222_v45, %v6924_v48  ;;  %v4171_v10 = vmax.f32 %v4043_v59, 0.0 }
 0x262   : > { %v4174_v1 = vmax.f32 %v4046_v34, 0.0  ;;  %v6667_v52 = vpop.f32.mrb[120].mxu1 }
 0x263   : > { %v4172_v61 = vmax.f32 %v4044_v7, 0.0  ;;  %v6797_v36 = vpop.f32.mrb[120].mxu0  ;;  %v2564_v53 = vpop.f32.mrb[121].mxu1 }
 0x264   : > { %v6133_v6 = vpack.c.bf16 %v4174_v1, %v4173_v60  ;;  %v6925_v37 = vadd.f32 %v6797_v36, %v6667_v52  ;;  %v3761_v8 = vpop.f32.mrb[121].mxu0  ;;  %v6668_v63 = vpop.f32.mrb[122].mxu1 }
 0x265   : > { %v6128_v49 = vpack.c.bf16 %v4172_v61, %v4171_v10  ;;  %v6926_v20 = vadd.f32 %v3761_v8, %v2564_v53  ;;  %v6798_v21 = vpop.f32.mrb[122].mxu0  ;;  %v2567_v11 = vpop.f32.mrb[123].mxu1 }
 0x266   : > { %6213 = vst [vmem:[%s8006_s21 + $0x1d8] sm:$0xff] %v6133_v6   ;;  %v4049_v39 = vadd.f32 %v8222_v45, %v6925_v37  ;;  %v6927_v55 = vadd.f32 %v6798_v21, %v6668_v63  ;;  %v3764_v2 = vpop.f32.mrb[123].mxu0 }
 0x267   : > { %6212 = vst [vmem:[%s8006_s21 + $0x1d0] sm:$0xff] %v6128_v49   ;;  %v4047_v51 = vadd.f32 %v8222_v45, %v6926_v20  ;;  %v6928_v17 = vadd.f32 %v3764_v2, %v2567_v11 }
 0x268   : > { %v4050_v23 = vadd.f32 %v8222_v45, %v6927_v55  ;;  %v4177_v58 = vmax.f32 %v4049_v39, 0.0 }
 0x269   : > { %v4048_v42 = vadd.f32 %v8222_v45, %v6928_v17  ;;  %v4175_v22 = vmax.f32 %v4047_v51, 0.0 }
 0x26a   : > { %v4178_v16 = vmax.f32 %v4050_v23, 0.0  ;;  %v6671_v9 = vpop.f32.mrb[124].mxu1 }
 0x26b   : > { %v4176_v14 = vmax.f32 %v4048_v42, 0.0  ;;  %v6801_v24 = vpop.f32.mrb[124].mxu0  ;;  %v2580_v26 = vpop.f32.mrb[125].mxu1 }
 0x26c   : > { %v6143_v44 = vpack.c.bf16 %v4178_v16, %v4177_v58  ;;  %v6929_v35 = vadd.f32 %v6801_v24, %v6671_v9  ;;  %v3777_v27 = vpop.f32.mrb[125].mxu0  ;;  %v6672_v19 = vpop.f32.mrb[126].mxu1 }
 0x26d   : > { %v6138_v57 = vpack.c.bf16 %v4176_v14, %v4175_v22  ;;  %v6930_v32 = vadd.f32 %v3777_v27, %v2580_v26  ;;  %v6802_v12 = vpop.f32.mrb[126].mxu0  ;;  %v2583_v33 = vpop.f32.mrb[127].mxu1 }
 0x26e   : > { %6215 = vst [vmem:[%s8006_s21 + $0x1e8] sm:$0xff] %v6143_v44   ;;  %v4053_v47 = vadd.f32 %v8222_v45, %v6929_v35  ;;  %v6931_v41 = vadd.f32 %v6802_v12, %v6672_v19  ;;  %v3780_v25 = vpop.f32.mrb[127].mxu0 }
 0x26f   : > { %6214 = vst [vmem:[%s8006_s21 + $0x1e0] sm:$0xff] %v6138_v57   ;;  %v4051_v13 = vadd.f32 %v8222_v45, %v6930_v32  ;;  %v6932_v15 = vadd.f32 %v3780_v25, %v2583_v33 }
 0x270   : > { %v4054_v28 = vadd.f32 %v8222_v45, %v6931_v41  ;;  %v4181_v38 = vmax.f32 %v4053_v47, 0.0 }
 0x271   : > { %v4052_v50 = vadd.f32 %v8222_v45, %v6932_v15  ;;  %v4179_v40 = vmax.f32 %v4051_v13, 0.0 }
 0x272   : > { %v4182_v46 = vmax.f32 %v4054_v28, 0.0 }
 0x273   : > { %v4180_v29 = vmax.f32 %v4052_v50, 0.0 }
 0x274   : > { %v6153_v30 = vpack.c.bf16 %v4182_v46, %v4181_v38 }
 0x275   : > { %v6148_v62 = vpack.c.bf16 %v4180_v29, %v4179_v40 }
 0x276   : > { %6217 = vst [vmem:[%s8006_s21 + $0x1f8] sm:$0xff] %v6153_v30  }
 0x277   : > { %6216 = vst [vmem:[%s8006_s21 + $0x1f0] sm:$0xff] %v6148_v62  }
 0x278   : > { %7332 = shalt.err (!%p7329_p5)
}
 0x279   : > { %s7333_s9 = scalar_lea.hbm %s8286_s4, 8192  ;;  %s7337_s18 = scalar_lea.hbm %s8343_s3, 16384 }
 0x27a   : > { %p7334_p6 = scmp.ne.s32.totalorder %s8286_s4, %s7333_s9  ;;  %p7338_p10 = scmp.lt.u32.totalorder %s8286_s4, %s8343_s3 }
 0x27b   : > { %p7339_p11 = scmp.lt.u32.totalorder %s7337_s18, %s7333_s9  ;;  %p7341_p13 = scmp.lt.u32.totalorder %s7333_s9, %s8286_s4 }
 0x27c   : > { %p7335_p7 = pnand %p7334_p6, %p7462_p4 }
 0x27d   : > { %p7340_p12 = por %p7339_p11, %p7338_p10 }
 0x27e   : > { %p7336_p9 = pneg %p7335_p7 }
 0x27f   : > { %p7342_p0 = por %p7341_p13, %p7340_p12 }
 0x281   : > { %p7343_p1 = pnand %p7342_p0, %p7336_p9 }
 0x283   : > { %7346 = shalt.err (!%p7343_p1)
}
 0x284   : > { %s7400_s23 = smov 64   ;;  %s7401_s26 = smov 4  }
 0x285   : > { %7066 = dma.vmem_to_hbm [thread:$0]  (%p7462_p4), %s8288_s28, 8192, %s8286_s4, %s8294_s15, %s7400_s23, %s7400_s23, %s7401_s26  }
 0x286 PF: > { %p7072_p2 = scmp.ge.s32.totalorder %s7397_s17, 2  ;;  %s4854_s27 = sand.u32 1, %s7377_s12  }
 0x287   : > { %s4855_s29 = scalar_lea.sflag [#allocation3], %s4854_s27 }
 0x288   : > { %p7069_p3 = pnand %p7072_p2, %p7469_p8 }
 0x28a   : > { %7372 = dma.done.wait (!%p7069_p3), %s4855_s29, 8192  }
 0x28b   : > { %7374 = vsyncadd (!%p7069_p3), %s4855_s29, 4294959104  ;;  %s16_s17 = sadd.s32 1, %s7397_s17   ;;  %s8380_s12 = smov %s7381_s13 }
 0x28c   : > { %p13_p5 = scmp.ge.s32.totalorder %s16_s17, 4   ;;  %s8381_s13 = smov %s7385_s14 }
 0x28d   : > { %s8382_s14 = smov %s7475_s25  ;;  %s8383_s15 = smov %s7393_s16 }
 0x28e   : > { %s8384_s16 = smov %s8386_s20  ;;  %15 = sbr.rel (!%p13_p5) target bundleno = 4 (0x4), region = 71 }
 0x295   :  { %4860 = vsyncpa [#allocation3], 1 }
 0x296   :  { %4862 = vsyncpa [#allocation3 + $0x1], 1 }

</bundles_post_ra>
